<compile_context>
chip_gen: v5e
topology: v5e:2x2
jax: 0.10.0
libtpu: 0.0.40
codegen_flags: <defaults>
</compile_context>

<pallas_src>
import jax
import jax.numpy as jnp
from jax.experimental import pallas as pl
from jax.experimental.pallas import tpu as pltpu


def _vae_neg_elbo_kernel(
    x_ref,        # (Bt, D)    data tile, values in [0, 1]
    eps_ref,      # (Bt, M)    standard-normal noise tile (reparameterization)
    w1_ref,       # (D, H)     encoder layer-1 weight         (VMEM-resident)
    b1_ref,       # (1, H)
    wh_ref,       # (H, 2M)    fused [mu | log_sigma] head weight
    bh_ref,       # (1, 2M)
    v1_ref,       # (M, H)     decoder layer-1 weight
    c1_ref,       # (1, H)
    v2_ref,       # (H, D)     decoder logits head
    c2_ref,       # (1, D)
    out_ref,      # (Bt, 1)    per-sample negative ELBO for this batch tile
):
    x = x_ref[...]
    eps = eps_ref[...]
    M = eps.shape[-1]

    # ---- encoder q(z|x) = N(mu, diag(sigma^2)) ----
    h = jnp.dot(x, w1_ref[...], preferred_element_type=jnp.float32) + b1_ref[...]
    h = jnp.maximum(h, 0.0)                                            # ReLU

    # fused mu / log_sigma head: one MXU pass, then static lane slices
    head = jnp.dot(h, wh_ref[...], preferred_element_type=jnp.float32) + bh_ref[...]
    mu = head[:, :M]
    log_sigma = head[:, M:]
    sigma = jnp.exp(log_sigma)

    # ---- reparameterized sample z = mu + sigma * eps (rsample) ----
    z = mu + sigma * eps

    # ---- decoder p(x|z) = Bernoulli(logits) ----
    hd = jnp.dot(z, v1_ref[...], preferred_element_type=jnp.float32) + c1_ref[...]
    hd = jnp.maximum(hd, 0.0)                                          # ReLU
    logits = jnp.dot(hd, v2_ref[...], preferred_element_type=jnp.float32) + c2_ref[...]

    # Bernoulli log-prob: x*logits - softplus(logits), summed over pixels (event dims)
    softplus = jnp.maximum(logits, 0.0) + jnp.log1p(jnp.exp(-jnp.abs(logits)))
    log_px = jnp.sum(x * logits - softplus, axis=-1, keepdims=True)    # (Bt, 1)

    # Analytic KL( N(mu, sigma^2) || N(0, I) ), summed over latent dims
    kl = 0.5 * jnp.sum(mu * mu + sigma * sigma - 1.0 - 2.0 * log_sigma,
                       axis=-1, keepdims=True)                         # (Bt, 1)

    # per-sample negative ELBO; batch mean happens in the wrapper
    out_ref[...] = -(log_px - kl)


def vae_neg_elbo(x_flat, eps, params, *, bt=128):
    """x_flat: (B, D) float32 in [0,1]; eps: (B, M) float32; params: dict of f32 arrays."""
    B, D = x_flat.shape
    M = eps.shape[-1]
    H = params["w1"].shape[1]

    bt = min(bt, B)
    assert B % bt == 0, f"batch {B} must be a multiple of the batch tile {bt}"
    num_tiles = B // bt

    # Fuse the two encoder heads into a single (H, 2M) weight / (1, 2M) bias.
    w_head = jnp.concatenate([params["w_mu"], params["w_ls"]], axis=1)
    b_head = jnp.concatenate([params["b_mu"], params["b_ls"]], axis=1)

    def full_spec(shape):
        # whole-array block, constant index -> DMA'd once, stays VMEM-resident
        return pl.BlockSpec(shape, lambda i: (0, 0))

    per_sample = pl.pallas_call(
        _vae_neg_elbo_kernel,
        out_shape=jax.ShapeDtypeStruct((B, 1), jnp.float32),
        grid_spec=pltpu.PrefetchScalarGridSpec(
            num_scalar_prefetch=0,
            grid=(num_tiles,),
            in_specs=[
                pl.BlockSpec((bt, D), lambda i: (i, 0)),   # x tile
                pl.BlockSpec((bt, M), lambda i: (i, 0)),   # eps tile
                full_spec((D, H)),      # w1
                full_spec((1, H)),      # b1
                full_spec((H, 2 * M)),  # fused head weight
                full_spec((1, 2 * M)),  # fused head bias
                full_spec((M, H)),      # v1
                full_spec((1, H)),      # c1
                full_spec((H, D)),      # v2
                full_spec((1, D)),      # c2
            ],
            out_specs=pl.BlockSpec((bt, 1), lambda i: (i, 0)),
        ),
        compiler_params=pltpu.CompilerParams(
            dimension_semantics=("parallel",)),            # both TCs on v7x
    )(
        x_flat, eps,
        params["w1"], params["b1"],
        w_head, b_head,
        params["v1"], params["c1"],
        params["v2"], params["c2"],
    )

    # final batch mean out of the hot loop (per-tile partials reduced here)
    return jnp.sum(per_sample) * jnp.float32(1.0 / B)


def _reference_neg_elbo(x_flat, eps, p):
    """Pure-JAX reference mirroring the PyTorch VAE.forward semantics."""
    h = jax.nn.relu(x_flat @ p["w1"] + p["b1"])
    mu = h @ p["w_mu"] + p["b_mu"]
    log_sigma = h @ p["w_ls"] + p["b_ls"]
    sigma = jnp.exp(log_sigma)
    z = mu + sigma * eps
    hd = jax.nn.relu(z @ p["v1"] + p["c1"])
    logits = hd @ p["v2"] + p["c2"]
    log_px = jnp.sum(x_flat * logits - jax.nn.softplus(logits), axis=-1)
    kl = 0.5 * jnp.sum(mu ** 2 + sigma ** 2 - 1.0 - 2.0 * log_sigma, axis=-1)
    return -jnp.mean(log_px - kl)


def _init_params(key, D, H, M):
    ks = jax.random.split(key, 6)
    s = 0.05
    return {
        "w1":   s * jax.random.normal(ks[0], (D, H), jnp.float32),
        "b1":   jnp.zeros((1, H), jnp.float32),
        "w_mu": s * jax.random.normal(ks[1], (H, M), jnp.float32),
        "b_mu": jnp.zeros((1, M), jnp.float32),
        "w_ls": s * jax.random.normal(ks[2], (H, M), jnp.float32),
        "b_ls": jnp.zeros((1, M), jnp.float32),
        "v1":   s * jax.random.normal(ks[3], (M, H), jnp.float32),
        "c1":   jnp.zeros((1, H), jnp.float32),
        "v2":   s * jax.random.normal(ks[4], (H, D), jnp.float32),
        "c2":   jnp.zeros((1, D), jnp.float32),
    }


if __name__ == "__main__":
    # NCHW image-like input; batch large enough to exercise the batch-tile grid
    B, C, Himg, Wimg = 256, 1, 16, 16
    D = C * Himg * Wimg                  # 256 flattened features
    HID, M = 128, 32                     # hidden width, latent dim
    BT = 128                             # batch tile -> grid = (2,)

    key = jax.random.PRNGKey(0)
    k_x, k_eps, k_p = jax.random.split(key, 3)

    # deterministic synthetic "image" batch in [0, 1], NCHW then flattened
    x_nchw = jax.nn.sigmoid(jax.random.normal(k_x, (B, C, Himg, Wimg), jnp.float32))
    x_flat = x_nchw.reshape(B, D)

    # reparameterization noise (the randomness of q.rsample())
    eps = jax.random.normal(k_eps, (B, M), jnp.float32)

    params = _init_params(k_p, D, HID, M)

    neg_elbo = jax.block_until_ready(vae_neg_elbo(x_flat, eps, params, bt=BT))
    ref = _reference_neg_elbo(x_flat, eps, params)

    assert jnp.isfinite(neg_elbo), "non-finite output"
    assert jnp.allclose(neg_elbo, ref, rtol=1e-4, atol=1e-4), (neg_elbo, ref)

    print("KERNEL_OK")
</pallas_src>

<mosaic_0001>
module attributes {stable_mosaic.version = 11 : i64} {
  func.func @_vae_neg_elbo_kernel(%arg0: i32, %arg1: memref<128x256xf32, #tpu.memory_space<vmem>>, %arg2: memref<128x32xf32, #tpu.memory_space<vmem>>, %arg3: memref<256x128xf32, #tpu.memory_space<vmem>>, %arg4: memref<1x128xf32, #tpu.memory_space<vmem>>, %arg5: memref<128x64xf32, #tpu.memory_space<vmem>>, %arg6: memref<1x64xf32, #tpu.memory_space<vmem>>, %arg7: memref<32x128xf32, #tpu.memory_space<vmem>>, %arg8: memref<1x128xf32, #tpu.memory_space<vmem>>, %arg9: memref<128x256xf32, #tpu.memory_space<vmem>>, %arg10: memref<1x256xf32, #tpu.memory_space<vmem>>, %arg11: memref<128x1xf32, #tpu.memory_space<vmem>>) attributes {dimension_semantics = [#tpu.dimension_semantics<parallel>], iteration_bounds = array<i64: 2>, scalar_prefetch = 0 : i64, scratch_operands = 0 : i64, tpu.core_type = #tpu.core_type<tc>, window_params = [{transform_indices = @transform_0, window_bounds = array<i64: 128, 256>}, {transform_indices = @transform_1, window_bounds = array<i64: 128, 32>}, {pipeline_mode = #tpu.pipeline_mode<synchronous>, transform_indices = @transform_2, window_bounds = array<i64: 256, 128>}, {pipeline_mode = #tpu.pipeline_mode<synchronous>, transform_indices = @transform_3, window_bounds = array<i64: 1, 128>}, {pipeline_mode = #tpu.pipeline_mode<synchronous>, transform_indices = @transform_4, window_bounds = array<i64: 128, 64>}, {pipeline_mode = #tpu.pipeline_mode<synchronous>, transform_indices = @transform_5, window_bounds = array<i64: 1, 64>}, {pipeline_mode = #tpu.pipeline_mode<synchronous>, transform_indices = @transform_6, window_bounds = array<i64: 32, 128>}, {pipeline_mode = #tpu.pipeline_mode<synchronous>, transform_indices = @transform_7, window_bounds = array<i64: 1, 128>}, {pipeline_mode = #tpu.pipeline_mode<synchronous>, transform_indices = @transform_8, window_bounds = array<i64: 128, 256>}, {pipeline_mode = #tpu.pipeline_mode<synchronous>, transform_indices = @transform_9, window_bounds = array<i64: 1, 256>}, {transform_indices = @transform_10, window_bounds = array<i64: 128, 1>}]} {
    %c0 = arith.constant 0 : index
    %c0_0 = arith.constant 0 : index
    %0 = vector.load %arg1[%c0, %c0_0] : memref<128x256xf32, #tpu.memory_space<vmem>>, vector<128x256xf32>
    %c0_1 = arith.constant 0 : index
    %c0_2 = arith.constant 0 : index
    %1 = vector.load %arg2[%c0_1, %c0_2] : memref<128x32xf32, #tpu.memory_space<vmem>>, vector<128x32xf32>
    %c0_3 = arith.constant 0 : index
    %c0_4 = arith.constant 0 : index
    %2 = vector.load %arg3[%c0_3, %c0_4] : memref<256x128xf32, #tpu.memory_space<vmem>>, vector<256x128xf32>
    %cst = arith.constant dense<0.000000e+00> : vector<128x128xf32>
    %3 = tpu.matmul %0, %2, %cst {dimension_numbers = #tpu.dot_dimension_numbers<[1], [0], [0], [1], [0, 0, 1, 1], [], []>} : vector<128x256xf32>, vector<256x128xf32>, vector<128x128xf32> -> vector<128x128xf32>
    %c0_5 = arith.constant 0 : index
    %c0_6 = arith.constant 0 : index
    %4 = vector.load %arg4[%c0_5, %c0_6] : memref<1x128xf32, #tpu.memory_space<vmem>>, vector<1x128xf32>
    %5 = vector.broadcast %4 : vector<1x128xf32> to vector<128x128xf32>
    %6 = arith.addf %3, %5 : vector<128x128xf32>
    %cst_7 = arith.constant 0.000000e+00 : f32
    %7 = vector.broadcast %cst_7 : f32 to vector<128x128xf32>
    %8 = arith.maximumf %6, %7 : vector<128x128xf32>
    %c0_8 = arith.constant 0 : index
    %c0_9 = arith.constant 0 : index
    %9 = vector.load %arg5[%c0_8, %c0_9] : memref<128x64xf32, #tpu.memory_space<vmem>>, vector<128x64xf32>
    %cst_10 = arith.constant dense<0.000000e+00> : vector<128x64xf32>
    %10 = tpu.matmul %8, %9, %cst_10 {dimension_numbers = #tpu.dot_dimension_numbers<[1], [0], [0], [1], [0, 0, 1, 1], [], []>} : vector<128x128xf32>, vector<128x64xf32>, vector<128x64xf32> -> vector<128x64xf32>
    %c0_11 = arith.constant 0 : index
    %c0_12 = arith.constant 0 : index
    %11 = vector.load %arg6[%c0_11, %c0_12] : memref<1x64xf32, #tpu.memory_space<vmem>>, vector<1x64xf32>
    %12 = vector.broadcast %11 : vector<1x64xf32> to vector<128x64xf32>
    %13 = arith.addf %10, %12 : vector<128x64xf32>
    %14 = vector.extract_strided_slice %13 {offsets = [0, 0], sizes = [128, 32], strides = [1, 1]} : vector<128x64xf32> to vector<128x32xf32>
    %15 = vector.extract_strided_slice %13 {offsets = [0, 32], sizes = [128, 32], strides = [1, 1]} : vector<128x64xf32> to vector<128x32xf32>
    %16 = math.exp %15 : vector<128x32xf32>
    %17 = arith.mulf %16, %1 : vector<128x32xf32>
    %18 = arith.addf %14, %17 : vector<128x32xf32>
    %c0_13 = arith.constant 0 : index
    %c0_14 = arith.constant 0 : index
    %19 = vector.load %arg7[%c0_13, %c0_14] : memref<32x128xf32, #tpu.memory_space<vmem>>, vector<32x128xf32>
    %cst_15 = arith.constant dense<0.000000e+00> : vector<128x128xf32>
    %20 = tpu.matmul %18, %19, %cst_15 {dimension_numbers = #tpu.dot_dimension_numbers<[1], [0], [0], [1], [0, 0, 1, 1], [], []>} : vector<128x32xf32>, vector<32x128xf32>, vector<128x128xf32> -> vector<128x128xf32>
    %c0_16 = arith.constant 0 : index
    %c0_17 = arith.constant 0 : index
    %21 = vector.load %arg8[%c0_16, %c0_17] : memref<1x128xf32, #tpu.memory_space<vmem>>, vector<1x128xf32>
    %22 = vector.broadcast %21 : vector<1x128xf32> to vector<128x128xf32>
    %23 = arith.addf %20, %22 : vector<128x128xf32>
    %cst_18 = arith.constant 0.000000e+00 : f32
    %24 = vector.broadcast %cst_18 : f32 to vector<128x128xf32>
    %25 = arith.maximumf %23, %24 : vector<128x128xf32>
    %c0_19 = arith.constant 0 : index
    %c0_20 = arith.constant 0 : index
    %26 = vector.load %arg9[%c0_19, %c0_20] : memref<128x256xf32, #tpu.memory_space<vmem>>, vector<128x256xf32>
    %cst_21 = arith.constant dense<0.000000e+00> : vector<128x256xf32>
    %27 = tpu.matmul %25, %26, %cst_21 {dimension_numbers = #tpu.dot_dimension_numbers<[1], [0], [0], [1], [0, 0, 1, 1], [], []>} : vector<128x128xf32>, vector<128x256xf32>, vector<128x256xf32> -> vector<128x256xf32>
    %c0_22 = arith.constant 0 : index
    %c0_23 = arith.constant 0 : index
    %28 = vector.load %arg10[%c0_22, %c0_23] : memref<1x256xf32, #tpu.memory_space<vmem>>, vector<1x256xf32>
    %29 = vector.broadcast %28 : vector<1x256xf32> to vector<128x256xf32>
    %30 = arith.addf %27, %29 : vector<128x256xf32>
    %cst_24 = arith.constant 0.000000e+00 : f32
    %31 = vector.broadcast %cst_24 : f32 to vector<128x256xf32>
    %32 = arith.maximumf %30, %31 : vector<128x256xf32>
    %33 = math.absf %30 : vector<128x256xf32>
    %cst_25 = arith.constant 0.000000e+00 : f32
    %34 = vector.broadcast %cst_25 : f32 to vector<128x256xf32>
    %35 = arith.subf %34, %33 : vector<128x256xf32>
    %36 = math.exp %35 : vector<128x256xf32>
    %37 = math.log1p %36 : vector<128x256xf32>
    %38 = arith.addf %32, %37 : vector<128x256xf32>
    %39 = arith.mulf %0, %30 : vector<128x256xf32>
    %40 = arith.subf %39, %38 : vector<128x256xf32>
    %cst_26 = arith.constant dense<0.000000e+00> : vector<128xf32>
    %41 = vector.multi_reduction <add>, %40, %cst_26 [1] : vector<128x256xf32> to vector<128xf32>
    %42 = vector.shape_cast %41 : vector<128xf32> to vector<128x1xf32>
    %43 = arith.mulf %14, %14 : vector<128x32xf32>
    %44 = arith.mulf %16, %16 : vector<128x32xf32>
    %45 = arith.addf %43, %44 : vector<128x32xf32>
    %cst_27 = arith.constant 1.000000e+00 : f32
    %46 = vector.broadcast %cst_27 : f32 to vector<128x32xf32>
    %47 = arith.subf %45, %46 : vector<128x32xf32>
    %cst_28 = arith.constant 2.000000e+00 : f32
    %48 = vector.broadcast %cst_28 : f32 to vector<128x32xf32>
    %49 = arith.mulf %48, %15 : vector<128x32xf32>
    %50 = arith.subf %47, %49 : vector<128x32xf32>
    %cst_29 = arith.constant dense<0.000000e+00> : vector<128xf32>
    %51 = vector.multi_reduction <add>, %50, %cst_29 [1] : vector<128x32xf32> to vector<128xf32>
    %52 = vector.shape_cast %51 : vector<128xf32> to vector<128x1xf32>
    %cst_30 = arith.constant 5.000000e-01 : f32
    %53 = vector.broadcast %cst_30 : f32 to vector<128x1xf32>
    %54 = arith.mulf %53, %52 : vector<128x1xf32>
    %55 = arith.subf %42, %54 : vector<128x1xf32>
    %cst_31 = arith.constant 0.000000e+00 : f32
    %56 = vector.broadcast %cst_31 : f32 to vector<128x1xf32>
    %57 = arith.subf %56, %55 : vector<128x1xf32>
    %c0_32 = arith.constant 0 : index
    %c0_33 = arith.constant 0 : index
    %58 = vector.load %arg11[%c0_32, %c0_33] : memref<128x1xf32, #tpu.memory_space<vmem>>, vector<128x1xf32>
    tpu.vector_store %arg11[%c0_32, %c0_33], %57 {strides = array<i32>} : memref<128x1xf32, #tpu.memory_space<vmem>>, vector<128x1xf32>,
    return
  }
  func.func @transform_0(%arg0: i32) -> (i32, i32) {
    %c0_i32 = arith.constant 0 : i32
    %c0_i32_0 = arith.constant 0 : i32
    return %arg0, %c0_i32 : i32, i32
  }
  func.func @transform_1(%arg0: i32) -> (i32, i32) {
    %c0_i32 = arith.constant 0 : i32
    %c0_i32_0 = arith.constant 0 : i32
    return %arg0, %c0_i32 : i32, i32
  }
  func.func @transform_2(%arg0: i32) -> (i32, i32) {
    %c0_i32 = arith.constant 0 : i32
    %c0_i32_0 = arith.constant 0 : i32
    %c0_i32_1 = arith.constant 0 : i32
    return %c0_i32, %c0_i32_0 : i32, i32
  }
  func.func @transform_3(%arg0: i32) -> (i32, i32) {
    %c0_i32 = arith.constant 0 : i32
    %c0_i32_0 = arith.constant 0 : i32
    %c0_i32_1 = arith.constant 0 : i32
    return %c0_i32, %c0_i32_0 : i32, i32
  }
  func.func @transform_4(%arg0: i32) -> (i32, i32) {
    %c0_i32 = arith.constant 0 : i32
    %c0_i32_0 = arith.constant 0 : i32
    %c0_i32_1 = arith.constant 0 : i32
    return %c0_i32, %c0_i32_0 : i32, i32
  }
  func.func @transform_5(%arg0: i32) -> (i32, i32) {
    %c0_i32 = arith.constant 0 : i32
    %c0_i32_0 = arith.constant 0 : i32
    %c0_i32_1 = arith.constant 0 : i32
    return %c0_i32, %c0_i32_0 : i32, i32
  }
  func.func @transform_6(%arg0: i32) -> (i32, i32) {
    %c0_i32 = arith.constant 0 : i32
    %c0_i32_0 = arith.constant 0 : i32
    %c0_i32_1 = arith.constant 0 : i32
    return %c0_i32, %c0_i32_0 : i32, i32
  }
  func.func @transform_7(%arg0: i32) -> (i32, i32) {
    %c0_i32 = arith.constant 0 : i32
    %c0_i32_0 = arith.constant 0 : i32
    %c0_i32_1 = arith.constant 0 : i32
    return %c0_i32, %c0_i32_0 : i32, i32
  }
  func.func @transform_8(%arg0: i32) -> (i32, i32) {
    %c0_i32 = arith.constant 0 : i32
    %c0_i32_0 = arith.constant 0 : i32
    %c0_i32_1 = arith.constant 0 : i32
    return %c0_i32, %c0_i32_0 : i32, i32
  }
  func.func @transform_9(%arg0: i32) -> (i32, i32) {
    %c0_i32 = arith.constant 0 : i32
    %c0_i32_0 = arith.constant 0 : i32
    %c0_i32_1 = arith.constant 0 : i32
    return %c0_i32, %c0_i32_0 : i32, i32
  }
  func.func @transform_10(%arg0: i32) -> (i32, i32) {
    %c0_i32 = arith.constant 0 : i32
    %c0_i32_0 = arith.constant 0 : i32
    return %arg0, %c0_i32 : i32, i32
  }
}

</mosaic_0001>

<bundles_post_ra>
// kernel: tpu_custom_call.1
= control target key start
LH: loop header
LB: loop body
LE: loop exit
PB: predicated region body
PF: predicated region fallthrough
CT: control target
= control target key end

     0   :  { %s4130_s0 = inlined_call_operand.hbm [shape: f32[256,256], index: 0, kind: input, shape index: {}]   ;;  %s4131_s1 = inlined_call_operand.vmem [shape: f32[256,32], index: 1, kind: input, shape index: {}]   ;;  %s4132_s2 = inlined_call_operand.vmem [shape: f32[256,128], index: 2, kind: input, shape index: {}]   ;;  %s4133_s3 = inlined_call_operand.vmem [shape: f32[1,128], index: 3, kind: input, shape index: {}]   ;;  %s4134_s4 = inlined_call_operand.vmem [shape: f32[128,64], index: 4, kind: input, shape index: {}]   ;;  %s4135_s5 = inlined_call_operand.vmem [shape: f32[1,64], index: 5, kind: input, shape index: {}]   ;;  %s4136_s6 = inlined_call_operand.vmem [shape: f32[32,128], index: 6, kind: input, shape index: {}]   ;;  %s4137_s7 = inlined_call_operand.vmem [shape: f32[1,128], index: 7, kind: input, shape index: {}]   ;;  %s4138_s8 = inlined_call_operand.hbm [shape: f32[128,256], index: 8, kind: input, shape index: {}]   ;;  %s4139_s9 = inlined_call_operand.vmem [shape: f32[1,256], index: 9, kind: input, shape index: {}]   ;;  %s4140_s10 = inlined_call_operand.vmem [shape: f32[256,1], index: 10, kind: output, shape index: {}]  }
   0x1   :  { %4142 = sst [smem:[#allocation8_spill]] %s4138_s8 }
   0x2   :  { %4143 = sst [smem:[#allocation9_spill]] %s4139_s9 }
   0x3   :  { %4144 = sst [smem:[#allocation10_spill]] %s4140_s10 }
   0x4   :  { %15 = vsyncpa [#allocation3], 0 }
   0x5   :  { %17 = vsyncpa [#allocation3 + $0x1], 0 }
   0x6   :  { %18 = vsyncpa [#allocation5], 0  ;;  %s2736_s13 = smov 0   ;;  %s2738_s14 = smov 0  }
   0x7   :  { %s2740_s15 = smov 0   ;;  %s2742_s16 = smov 0  }
   0x8 LB: > { %s4141_s17 = sadd.s32 4294967295, %s2674_s16   ;;  %p44_p0 = scmp.ne.s32.totalorder %s2666_s14, %s2662_s13  ;;  %s2674_s16 = sphi %s2742_s16, %s4186_s16   ;;  %s2670_s15 = sphi %s2740_s15, %s4185_s15   ;;  %s2666_s14 = sphi %s2738_s14, %s4184_s14   ;;  %s2662_s13 = sphi %s2736_s13, %s4183_s13  }
   0x9   : > { %p2758_p1 = scmp.eq.s32.totalorder %s4141_s17, 0  ;;  %p2257_p2 = scmp.ge.s32.totalorder %s2674_s16, 1 }
   0xa   : > { %p275_p3 = scmp.lt.s32.totalorder %s2674_s16, 3  ;;  %s4147_s8 = sld [smem:[#allocation8_spill]] }
   0xb   : > { %p2766_p4 = por %p2758_p1, %p44_p0  ;;  %s2676_s24 = smov [#allocation4]  }
   0xc   : > { %p2773_p5 = pnand %p2257_p2, %p275_p3  ;;  %s306_s25 = sshll.u32 %s2676_s24, 4  ;;  %s307_s25 = int_to_ptr.vmem [resolvable:$true] %s306_s25 }
   0xd   : > { %s2782_s26 = sadd.s32 1, %s2674_s16   ;;  %s2677_s27 = smov 256  }
   0xe   : > { %p2333_p6 = pneg %p2773_p5  ;;  %s2678_s28 = smov 16  }
   0xf   : > { %s28_s29 = ssub.s32 %s2674_s16, %s2782_s26  ;;  %s31_s30 = sadd.s32 1, %s2670_s15 }
  0x10   : > { %s304_s22 = sshll.u32 %s4147_s8, 4  ;;  %p2334_p7 = pnand %p2333_p6, %p2758_p1  ;;  %s305_s22 = int_to_ptr.hbm [resolvable:$true] %s304_s22 }
  0x11   : > { %p29_p8 = scmp.eq.s32.totalorder %s28_s29, 0  ;;  %p38_p9 = scmp.ne.s32.totalorder %s2670_s15, %s2666_s14 }
  0x12   : > { %2336 = dma.hbm_to_vmem [thread:$0]  (!%p2334_p7), %s305_s22, 4096, %s307_s25, [#allocation5], %s2677_s27, %s2677_s27, %s2678_s28  }
  0x13   : > { %p39_p10 = scmp.eq.s32.totalorder %s2674_s16, 0  ;;  %p2342_p11 = scmp.lt.s32.totalorder %s2674_s16, 2 }
  0x14   : > { %s2795_s11 = scalar_select %p29_p8, %s2670_s15, %s31_s30  }
  0x15   : > { %p40_p12 = por %p39_p10, %p38_p9  ;;  %s323_s12 = sand.u32 1, %s2670_s15  }
  0x16   : > { %s2260_s13 = sshll.u32 %s323_s12, 8  ;;  %s2306_s20 = sshll.u32 %s2674_s16, 8 }
  0x17   : > { %s333_s17 = scalar_lea.hbm %s4130_s0, %s2306_s20  ;;  %s327_s8 = scalar_lea.vmem [#allocation2], %s2260_s13 }
  0x18   : > { %s336_s10 = sshll.u32 %s327_s8, 4  ;;  %s334_s9 = sshll.u32 %s333_s17, 4  ;;  %s337_s10 = int_to_ptr.vmem [resolvable:$true] %s336_s10  ;;  %s335_s9 = int_to_ptr.hbm [resolvable:$true] %s334_s9 }
  0x19   : > { %p2802_p13 = pnand %p2342_p11, %p40_p12  ;;  %s324_s25 = scalar_lea.sflag [#allocation3], %s323_s12 }
  0x1a   : > { %s2606_s29 = sshra.s32 %s335_s9, 4  ;;  %s2613_s8 = scalar_lea.hbm %s4130_s0, 512  ;;  %s2607_s29 = int_to_ptr.hbm [resolvable:$true] %s2606_s29 }
  0x1b   : > { %s2608_s30 = scalar_lea.hbm %s2607_s29, 256  ;;  %p2610_p2 = pneg %p2802_p13 }
  0x1c   : > { %p2609_p0 = scmp.ne.s32.totalorder %s2607_s29, %s2608_s30  ;;  %p2614_p7 = scmp.lt.s32.totalorder %s2607_s29, %s4130_s0 }
  0x1d   : > { %p2615_p8 = scmp.lt.s32.totalorder %s2613_s8, %s2608_s30 }
  0x1e   : > { %p2611_p3 = pnand %p2610_p2, %p2609_p0 }
  0x1f   : > { %p2616_p9 = por %p2615_p8, %p2614_p7 }
  0x20   : > { %p2612_p6 = pneg %p2611_p3 }
  0x22   : > { %p2617_p10 = pnand %p2616_p9, %p2612_p6 }
  0x24   : > { %2620 = shalt.err (!%p2617_p10)
}
  0x25   : > { %2340 = dma.hbm_to_vmem [thread:$0]  (!%p2802_p13), %s335_s9, 4096, %s337_s10, %s324_s25, %s2677_s27, %s2677_s27, %s2678_s28  }
  0x26   : > { %357 = sbr.rel (%p2773_p5) target bundleno = 1200 (0x4b0), region = 60  ;;  %s359_s12 = sand.u32 (!%p2773_p5), 1, %s2666_s14  }
  0x27   : > { %s2265_s24 = sshll.u32 (!%p2773_p5), %s359_s12, 8  ;;  %s360_s20 = scalar_lea.sflag (!%p2773_p5), [#allocation3], %s359_s12 }
  0x28   : > { %s2822_s13 = scalar_lea.vmem (!%p2773_p5), [#allocation2], %s2265_s24 }
  0x2b   : > { %2653 = dma.done.wait (%p2766_p4), %s360_s20, 4096  }
  0x2c   : > { %2655 = vsyncadd (%p2766_p4), %s360_s20, 4294963200 }
  0x2d   : > { %2657 = dma.done.wait (%p2758_p1), [#allocation5], 4096  }
  0x2e   : > { %2659 = vsyncadd (%p2758_p1), [#allocation5], 4294963200  ;;  %v487_v0 = vld [vmem:[%s4132_s2 + $0x78] sm:$0xff]  ;;  %v486_v1 = vld [vmem:[%s4132_s2 + $0x70] sm:$0xff]  ;;  %s4150_s8 = sadd.s32 4294967295, %s2674_s16   ;;  %s2679_s10 = smov 32  }
  0x2f   : > { %2307 = vmatpush.msra.mxu1 %v487_v0  ;;  %508 = vmatpush.msra.mxu0 %v487_v0  ;;  %v485_v2 = vld [vmem:[%s4132_s2 + $0x68] sm:$0xff]  ;;  %v484_v3 = vld [vmem:[%s4132_s2 + $0x60] sm:$0xff]  ;;  %v483_v4 = vld [vmem:[%s4132_s2 + $0x58] sm:$0xff]  ;;  %s2267_s17 = sshll.u32 %s4150_s8, 4  ;;  %s2680_s28 = smov 96   ;;  %vm939_vm0 = vcmask 261120  }
  0x30   : > { %v482_v5 = vld [vmem:[%s4132_s2 + $0x50] sm:$0xff]  ;;  %v481_v6 = vld [vmem:[%s4132_s2 + $0x48] sm:$0xff]  ;;  %v480_v7 = vld [vmem:[%s4132_s2 + $0x40] sm:$0xff]  ;;  %p413_p1 = scmp.lt.s32.totalorder %s2267_s17, 31 }
  0x31   : > { %2308 = vmatpush.msra.mxu1 %v486_v1  ;;  %509 = vmatpush.msra.mxu0 %v486_v1  ;;  %v479_v8 = vld [vmem:[%s4132_s2 + $0x38] sm:$0xff]  ;;  %v478_v9 = vld [vmem:[%s4132_s2 + $0x30] sm:$0xff]  ;;  %v477_v10 = vld [vmem:[%s4132_s2 + $0x28] sm:$0xff] }
  0x32   : > { %v476_v11 = vld [vmem:[%s4132_s2 + $0x20] sm:$0xff]  ;;  %v475_v12 = vld [vmem:[%s4132_s2 + $0x18] sm:$0xff]  ;;  %v474_v13 = vld [vmem:[%s4132_s2 + $0x10] sm:$0xff]  ;;  %s4188_s17 = smov (!%p413_p1, %s2267_s17), 31 }
  0x33   : > { %2309 = vmatpush.msra.mxu1 %v485_v2  ;;  %510 = vmatpush.msra.mxu0 %v485_v2  ;;  %v473_v14 = vld [vmem:[%s4132_s2 + $0x8] sm:$0xff]  ;;  %v472_v15 = vld [vmem:[%s4132_s2] sm:$0xff]  ;;  %v503_v17 = vld [vmem:[%s4132_s2 + $0xf8] sm:$0xff]  ;;  %s2268_s21 = sshll.u32 %s4188_s17, 3 }
  0x34   : > { %v440_v16 = vld [vmem:[%s2822_s13 + $0x80] sm:$0xff]  ;;  %v502_v18 = vld [vmem:[%s4132_s2 + $0xf0] sm:$0xff]  ;;  %v501_v19 = vld [vmem:[%s4132_s2 + $0xe8] sm:$0xff]  ;;  %s3040_s9 = scalar_lea.vmem %s4131_s1, %s2268_s21 }
  0x35   : > { %2310 = vmatpush.msra.mxu1 %v484_v3  ;;  %511 = vmatpush.msra.mxu0 %v484_v3  ;;  %v500_v20 = vld [vmem:[%s4132_s2 + $0xe0] sm:$0xff]  ;;  %v442_v21 = vld [vmem:[%s2822_s13 + $0x90] sm:$0xff]  ;;  %v499_v22 = vld [vmem:[%s4132_s2 + $0xd8] sm:$0xff] }
  0x36   : > { %v498_v23 = vld [vmem:[%s4132_s2 + $0xd0] sm:$0xff]  ;;  %v497_v24 = vld [vmem:[%s4132_s2 + $0xc8] sm:$0xff]  ;;  %v496_v25 = vld [vmem:[%s4132_s2 + $0xc0] sm:$0xff] }
  0x37   : > { %2311 = vmatpush.msra.mxu1 %v483_v4  ;;  %512 = vmatpush.msra.mxu0 %v483_v4  ;;  %v444_v26 = vld [vmem:[%s2822_s13 + $0xa0] sm:$0xff]  ;;  %v495_v27 = vld [vmem:[%s4132_s2 + $0xb8] sm:$0xff]  ;;  %v494_v28 = vld [vmem:[%s4132_s2 + $0xb0] sm:$0xff] }
  0x38   : > { %v493_v29 = vld [vmem:[%s4132_s2 + $0xa8] sm:$0xff]  ;;  %v492_v30 = vld [vmem:[%s4132_s2 + $0xa0] sm:$0xff]  ;;  %v446_v31 = vld [vmem:[%s2822_s13 + $0xb0] sm:$0xff] }
  0x39   : > { %2312 = vmatpush.msra.mxu1 %v482_v5  ;;  %513 = vmatpush.msra.mxu0 %v482_v5  ;;  %v491_v32 = vld [vmem:[%s4132_s2 + $0x98] sm:$0xff]  ;;  %v490_v33 = vld [vmem:[%s4132_s2 + $0x90] sm:$0xff]  ;;  %v424_v34 = vld [vmem:[%s2822_s13] sm:$0xff] }
  0x3a   : > { %v489_v35 = vld [vmem:[%s4132_s2 + $0x88] sm:$0xff]  ;;  %v488_v36 = vld [vmem:[%s4132_s2 + $0x80] sm:$0xff]  ;;  %v426_v38 = vld [vmem:[%s2822_s13 + $0x10] sm:$0xff] }
  0x3b   : > { %2313 = vmatpush.msra.mxu1 %v481_v6  ;;  %514 = vmatpush.msra.mxu0 %v481_v6  ;;  %v448_v37 = vld [vmem:[%s2822_s13 + $0xc0] sm:$0xff]  ;;  %v450_v39 = vld [vmem:[%s2822_s13 + $0xd0] sm:$0xff]  ;;  %v425_v45 = vld [vmem:[%s2822_s13 + $0x8] sm:$0xff] }
  0x3c   : > { %v428_v40 = vld [vmem:[%s2822_s13 + $0x20] sm:$0xff]  ;;  %v430_v42 = vld [vmem:[%s2822_s13 + $0x30] sm:$0xff]  ;;  %v427_v47 = vld [vmem:[%s2822_s13 + $0x18] sm:$0xff] }
  0x3d   : > { %2314 = vmatpush.msra.mxu1 %v480_v7  ;;  %515 = vmatpush.msra.mxu0 %v480_v7  ;;  %v452_v41 = vld [vmem:[%s2822_s13 + $0xe0] sm:$0xff]  ;;  %v454_v43 = vld [vmem:[%s2822_s13 + $0xf0] sm:$0xff]  ;;  %v429_v49 = vld [vmem:[%s2822_s13 + $0x28] sm:$0xff] }
  0x3e   : > { %v432_v44 = vld [vmem:[%s2822_s13 + $0x40] sm:$0xff]  ;;  %v434_v46 = vld [vmem:[%s2822_s13 + $0x50] sm:$0xff]  ;;  %v431_v51 = vld [vmem:[%s2822_s13 + $0x38] sm:$0xff] }
  0x3f   : > { %2315 = vmatpush.msra.mxu1 %v479_v8  ;;  %516 = vmatpush.msra.mxu0 %v479_v8  ;;  %v436_v48 = vld [vmem:[%s2822_s13 + $0x60] sm:$0xff]  ;;  %v438_v50 = vld [vmem:[%s2822_s13 + $0x70] sm:$0xff]  ;;  %v433_v52 = vld [vmem:[%s2822_s13 + $0x48] sm:$0xff] }
  0x40   : > { %v435_v53 = vld [vmem:[%s2822_s13 + $0x58] sm:$0xff]  ;;  %v437_v54 = vld [vmem:[%s2822_s13 + $0x68] sm:$0xff]  ;;  %v668_v59 = vld [vmem:[%s4134_s4 + $0x70] sm:$0xff] }
  0x41   : > { %2316 = vmatpush.msra.mxu1 %v478_v9  ;;  %517 = vmatpush.msra.mxu0 %v478_v9  ;;  %v439_v55 = vld [vmem:[%s2822_s13 + $0x78] sm:$0xff]  ;;  %v441_v57 = vld [vmem:[%s2822_s13 + $0x88] sm:$0xff]  ;;  %v666_v63 = vld [vmem:[%s4134_s4 + $0x60] sm:$0xff] }
  0x42   : > { %v669_v58 = vld [vmem:[%s4134_s4 + $0x78] sm:$0xff]  ;;  %v667_v62 = vld [vmem:[%s4134_s4 + $0x68] sm:$0xff]  ;;  %v664_v1 = vld [vmem:[%s4134_s4 + $0x50] sm:$0xff] }
  0x43   : > { %2317 = vmatpush.msra.mxu1 %v477_v10  ;;  %518 = vmatpush.msra.mxu0 %v477_v10  ;;  %v443_v61 = vld [vmem:[%s2822_s13 + $0x98] sm:$0xff]  ;;  %v445_v3 = vld [vmem:[%s2822_s13 + $0xa8] sm:$0xff]  ;;  %v662_v5 = vld [vmem:[%s4134_s4 + $0x40] sm:$0xff] }
  0x44   : > { %674 = vmatpush.msra.mxu2 %v669_v58  ;;  %v665_v0 = vld [vmem:[%s4134_s4 + $0x58] sm:$0xff]  ;;  %v663_v4 = vld [vmem:[%s4134_s4 + $0x48] sm:$0xff]  ;;  %v660_v7 = vld [vmem:[%s4134_s4 + $0x30] sm:$0xff] }
  0x45   : > { %2318 = vmatpush.msra.mxu1 %v476_v11  ;;  %519 = vmatpush.msra.mxu0 %v476_v11  ;;  %v661_v6 = vld [vmem:[%s4134_s4 + $0x38] sm:$0xff]  ;;  %v659_v10 = vld [vmem:[%s4134_s4 + $0x28] sm:$0xff]  ;;  %v658_v11 = vld [vmem:[%s4134_s4 + $0x20] sm:$0xff] }
  0x46   : > { %675 = vmatpush.msra.mxu2 %v668_v59  ;;  %v447_v9 = vld [vmem:[%s2822_s13 + $0xb8] sm:$0xff] }
  0x47   : > { %2319 = vmatpush.msra.mxu1 %v475_v12  ;;  %520 = vmatpush.msra.mxu0 %v475_v12  ;;  %v657_v12 = vld [vmem:[%s4134_s4 + $0x18] sm:$0xff] }
  0x48   : > { %676 = vmatpush.msra.mxu2 %v667_v62 }
  0x49   : > { %2320 = vmatpush.msra.mxu1 %v474_v13  ;;  %521 = vmatpush.msra.mxu0 %v474_v13  ;;  %v656_v13 = vld [vmem:[%s4134_s4 + $0x10] sm:$0xff] }
  0x4a   : > { %677 = vmatpush.msra.mxu2 %v666_v63 }
  0x4b   : > { %2321 = vmatpush.msra.mxu1 %v473_v14  ;;  %522 = vmatpush.msra.mxu0 %v473_v14 }
  0x4c   : > { %678 = vmatpush.msra.mxu2 %v665_v0  ;;  %v462_v0 = vld [vmem:[%s3040_s9 + $0x30] sm:$0xff] }
  0x4d   : > { %2322 = vmatpush.msra.mxu1 %v472_v15  ;;  %523 = vmatpush.msra.mxu0 %v472_v15  ;;  %v449_v15 = vld [vmem:[%s2822_s13 + $0xc8] sm:$0xff] }
  0x4e   : > { %548 = vmatmul.f32.vlgmr.msra.gmra.mxu1 %v440_v16  ;;  %524 = vmatmul.f32.vlgmr.msra.gmra.mxu0 %v424_v34  ;;  %v655_v16 = vld [vmem:[%s4134_s4 + $0x8] sm:$0xff] }
  0x4f   : > { %573 = vmatpush.msrb.mxu1 %v503_v17  ;;  %679 = vmatpush.msra.mxu2 %v664_v1  ;;  %v654_v17 = vld [vmem:[%s4134_s4] sm:$0xff] }
  0x51   : > { %574 = vmatpush.msrb.mxu1 %v502_v18  ;;  %680 = vmatpush.msra.mxu2 %v663_v4 }
  0x53   : > { %575 = vmatpush.msrb.mxu1 %v501_v19  ;;  %681 = vmatpush.msra.mxu2 %v662_v5  ;;  %v451_v19 = vld [vmem:[%s2822_s13 + $0xd8] sm:$0xff] }
  0x55   : > { %576 = vmatpush.msrb.mxu1 %v500_v20  ;;  %682 = vmatpush.msra.mxu2 %v661_v6 }
  0x56   : > { %551 = vmatmul.f32.gmra.mxu1 %v442_v21  ;;  %527 = vmatmul.f32.gmra.mxu0 %v426_v38 }
  0x57   : > { %577 = vmatpush.msrb.mxu1 %v499_v22  ;;  %683 = vmatpush.msra.mxu2 %v660_v7  ;;  %v453_v22 = vld [vmem:[%s2822_s13 + $0xe8] sm:$0xff]  ;;  %v460_v7 = vld [vmem:[%s3040_s9 + $0x20] sm:$0xff] }
  0x58   : > { %795 = vrot.lane.b32.xlu2 %v460_v7, %s2679_s10  ;;  %v465_v7 = vld [vmem:[%s3040_s9 + $0x48] sm:$0xff] }
  0x59   : > { %578 = vmatpush.msrb.mxu1 %v498_v23  ;;  %684 = vmatpush.msra.mxu2 %v659_v10 }
  0x5b   : > { %579 = vmatpush.msrb.mxu1 %v497_v24  ;;  %685 = vmatpush.msra.mxu2 %v658_v11 }
  0x5d   : > { %580 = vmatpush.msrb.mxu1 %v496_v25  ;;  %686 = vmatpush.msra.mxu2 %v657_v12  ;;  %v455_v25 = vld [vmem:[%s2822_s13 + $0xf8] sm:$0xff] }
  0x5e   : > { %554 = vmatmul.f32.gmra.mxu1 %v444_v26  ;;  %530 = vmatmul.f32.gmra.mxu0 %v428_v40  ;;  %v3032_v26 = vld [vmem:[%s4133_s3] ss:$0 sm:$0xff] }
  0x5f   : > { %581 = vmatpush.msrb.mxu1 %v495_v27  ;;  %687 = vmatpush.msra.mxu2 %v656_v13  ;;  %v461_v13 = vld [vmem:[%s3040_s9 + $0x28] sm:$0xff] }
  0x60   : > { %797 = vrot.lane.b32.xlu2 %v461_v13, %s2679_s10 }
  0x61   : > { %582 = vmatpush.msrb.mxu1 %v494_v28  ;;  %688 = vmatpush.msra.mxu2 %v655_v16 }
  0x63   : > { %583 = vmatpush.msrb.mxu1 %v493_v29  ;;  %689 = vmatpush.msra.mxu2 %v654_v17 }
  0x65   : > { %584 = vmatpush.msrb.mxu1 %v492_v30  ;;  %v456_v30 = vld [vmem:[%s3040_s9] sm:$0xff] }
  0x66   : > { %557 = vmatmul.f32.gmra.mxu1 %v446_v31  ;;  %533 = vmatmul.f32.gmra.mxu0 %v430_v42 }
  0x67   : > { %585 = vmatpush.msrb.mxu1 %v491_v32  ;;  %787 = vrot.lane.b32.xlu0 %v456_v30, %s2679_s10 }
  0x69   : > { %586 = vmatpush.msrb.mxu1 %v490_v33 }
  0x6b   : > { %587 = vmatpush.msrb.mxu1 %v489_v35  ;;  %v457_v35 = vld [vmem:[%s3040_s9 + $0x8] sm:$0xff] }
  0x6d   : > { %588 = vmatpush.msrb.mxu1 %v488_v36 }
  0x6e   : > { %560 = vmatmul.f32.gmra.mxu1 %v448_v37  ;;  %536 = vmatmul.f32.gmra.mxu0 %v432_v44 }
  0x6f   : > { %789 = vrot.lane.b32.xlu0 %v457_v35, %s2679_s10 }
  0x76   : > { %563 = vmatmul.f32.gmra.mxu1 %v450_v39  ;;  %539 = vmatmul.f32.gmra.mxu0 %v434_v46 }
  0x7e   : > { %566 = vmatmul.f32.gmra.mxu1 %v452_v41  ;;  %542 = vmatmul.f32.gmra.mxu0 %v436_v48  ;;  %v458_v41 = vld [vmem:[%s3040_s9 + $0x10] sm:$0xff] }
  0x7f   : > { %791 = vrot.lane.b32.xlu1 %v458_v41, %s2679_s10 }
  0x86   : > { %569 = vmatmul.f32.gmra.mxu1 %v454_v43  ;;  %545 = vmatmul.f32.gmra.mxu0 %v438_v50 }
  0x8e   : > { %589 = vmatmul.f32.vlgmr.msrb.gmra.mxu1 %v425_v45 }
  0x96   : > { %592 = vmatmul.f32.gmra.mxu1 %v427_v47  ;;  %v459_v47 = vld [vmem:[%s3040_s9 + $0x18] sm:$0xff] }
  0x97   : > { %793 = vrot.lane.b32.xlu1 %v459_v47, %s2679_s10 }
  0x9e   : > { %595 = vmatmul.f32.gmra.mxu1 %v429_v49 }
  0x9f   : > { %799 = vrot.lane.b32.xlu1 %v462_v0, %s2679_s10 }
  0xa6   : > { %598 = vmatmul.f32.gmra.mxu1 %v431_v51 }
  0xae   : > { %601 = vmatmul.f32.gmra.mxu1 %v433_v52 }
  0xb6   : > { %604 = vmatmul.f32.gmra.mxu1 %v435_v53 }
  0xbe   : > { %607 = vmatmul.f32.gmra.mxu1 %v437_v54 }
  0xc6   : > { %610 = vmatmul.f32.gmra.mxu1 %v439_v55 }
  0xcb   : > { %v2952_v56 = vpop.f32.mrf.mxu1  ;;  %v525_v20 = vpop.f32.mrf.mxu0 }
  0xcc   : > { %v526_v27 = vadd.f32 %v3032_v26, %v525_v20  ;;  %v550_v11 = vadd.f32 %v3032_v26, %v2952_v56 }
  0xce   : > { %613 = vmatmul.f32.gmra.mxu1 %v441_v57 }
  0xd3   : > { %v2961_v60 = vpop.f32.mrf.mxu1  ;;  %v528_v23 = vpop.f32.mrf.mxu0 }
  0xd4   : > { %v529_v33 = vadd.f32 %v3032_v26, %v528_v23  ;;  %v553_v17 = vadd.f32 %v3032_v26, %v2961_v60 }
  0xd6   : > { %616 = vmatmul.f32.gmra.mxu1 %v443_v61 }
  0xdb   : > { %v2976_v2 = vpop.f32.mrf.mxu1  ;;  %v531_v29 = vpop.f32.mrf.mxu0 }
  0xdc   : > { %v532_v39 = vadd.f32 %v3032_v26, %v531_v29  ;;  %v556_v23 = vadd.f32 %v3032_v26, %v2976_v2 }
  0xde   : > { %619 = vmatmul.f32.gmra.mxu1 %v445_v3 }
  0xe3   : > { %v2991_v8 = vpop.f32.mrf.mxu1  ;;  %v534_v37 = vpop.f32.mrf.mxu0 }
  0xe4   : > { %v535_v45 = vadd.f32 %v3032_v26, %v534_v37 }
  0xe6   : > { %622 = vmatmul.f32.gmra.mxu1 %v447_v9 }
  0xeb   : > { %v3006_v14 = vpop.f32.mrf.mxu1  ;;  %v537_v44 = vpop.f32.mrf.mxu0 }
  0xec   : > { %v538_v50 = vadd.f32 %v3032_v26, %v537_v44  ;;  %v562_v60 = vadd.f32 %v3032_v26, %v3006_v14 }
  0xee   : > { %625 = vmatmul.f32.gmra.mxu1 %v449_v15 }
  0xf3   : > { %v3015_v18 = vpop.f32.mrf.mxu1  ;;  %v540_v51 = vpop.f32.mrf.mxu0 }
  0xf4   : > { %v541_v55 = vadd.f32 %v3032_v26, %v540_v51  ;;  %v565_v2 = vadd.f32 %v3032_v26, %v3015_v18  ;;  %v3082_v18 = vld [vmem:[%s4135_s5] ss:$0 sm:$0xff] }
  0xf6   : > { %628 = vmatmul.f32.gmra.mxu1 %v451_v19 }
  0xfb   : > { %v3020_v21 = vpop.f32.mrf.mxu1  ;;  %v543_v58 = vpop.f32.mrf.mxu0 }
  0xfc   : > { %v544_v62 = vadd.f32 %v3032_v26, %v543_v58  ;;  %v792_v58 = vpop.permute.xlu1 %791 }
  0xfe   : > { %631 = vmatmul.f32.gmra.mxu1 %v453_v22 }
 0x103   : > { %v3025_v24 = vpop.f32.mrf.mxu1  ;;  %v546_v3 = vpop.f32.mrf.mxu0 }
 0x104   : > { %v547_v5 = vadd.f32 %v3032_v26, %v546_v3  ;;  %v571_v14 = vadd.f32 %v3032_v26, %v3025_v24 }
 0x106   : > { %634 = vmatmul.f32.gmra.mxu1 %v455_v25 }
 0x10b   : > { %v590_v28 = vpop.f32.mrf.mxu1 }
 0x10c   : > { %v591_v31 = vadd.f32 %v590_v28, %v526_v27  ;;  %v559_v28 = vadd.f32 %v3032_v26, %v2991_v8  ;;  %v568_v8 = vadd.f32 %v3032_v26, %v3020_v21 }
 0x10e   : > { %v638_v32 = vmax.f32 %v591_v31, 0.0 }
 0x110   : > { %690 = vmatmul.f32.vlgmr.msra.gmra.mxu2 %v638_v32 }
 0x113   : > { %v593_v34 = vpop.f32.mrf.mxu1 }
 0x114   : > { %v594_v36 = vadd.f32 %v593_v34, %v529_v33 }
 0x116   : > { %v639_v38 = vmax.f32 %v594_v36, 0.0 }
 0x118   : > { %693 = vmatmul.f32.gmra.mxu2 %v639_v38 }
 0x11b   : > { %v596_v40 = vpop.f32.mrf.mxu1 }
 0x11c   : > { %v597_v42 = vadd.f32 %v596_v40, %v532_v39 }
 0x11e   : > { %v640_v43 = vmax.f32 %v597_v42, 0.0 }
 0x120   : > { %696 = vmatmul.f32.gmra.mxu2 %v640_v43 }
 0x123   : > { %v599_v46 = vpop.f32.mrf.mxu1 }
 0x124   : > { %v600_v48 = vadd.f32 %v599_v46, %v535_v45  ;;  %v788_v46 = vpop.permute.xlu0 %787 }
 0x126   : > { %v641_v49 = vmax.f32 %v600_v48, 0.0 }
 0x128   : > { %699 = vmatmul.f32.gmra.mxu2 %v641_v49 }
 0x12b   : > { %v602_v52 = vpop.f32.mrf.mxu1 }
 0x12c   : > { %v603_v53 = vadd.f32 %v602_v52, %v538_v50  ;;  %v790_v52 = vpop.permute.xlu0 %789 }
 0x12e   : > { %v642_v54 = vmax.f32 %v603_v53, 0.0 }
 0x130   : > { %702 = vmatmul.f32.gmra.mxu2 %v642_v54  ;;  %v463_v54 = vld [vmem:[%s3040_s9 + $0x38] sm:$0xff] }
 0x133   : > { %v605_v57 = vpop.f32.mrf.mxu1 }
 0x134   : > { %v606_v59 = vadd.f32 %v605_v57, %v541_v55 }
 0x136   : > { %v643_v61 = vmax.f32 %v606_v59, 0.0 }
 0x138   : > { %705 = vmatmul.f32.gmra.mxu2 %v643_v61 }
 0x13b   : > { %v608_v63 = vpop.f32.mrf.mxu1 }
 0x13c   : > { %v609_v1 = vadd.f32 %v608_v63, %v544_v62  ;;  %v464_v63 = vld [vmem:[%s3040_s9 + $0x40] sm:$0xff] }
 0x13e   : > { %v644_v4 = vmax.f32 %v609_v1, 0.0 }
 0x140   : > { %708 = vmatmul.f32.gmra.mxu2 %v644_v4 }
 0x143   : > { %v611_v6 = vpop.f32.mrf.mxu1 }
 0x144   : > { %v612_v9 = vadd.f32 %v611_v6, %v547_v5  ;;  %v794_v5 = vpop.permute.xlu1 %793 }
 0x146   : > { %v645_v10 = vmax.f32 %v612_v9, 0.0 }
 0x148   : > { %711 = vmatmul.f32.gmra.mxu2 %v645_v10 }
 0x14b   : > { %v614_v12 = vpop.f32.mrf.mxu1 }
 0x14c   : > { %v615_v15 = vadd.f32 %v614_v12, %v550_v11  ;;  %v796_v11 = vpop.permute.xlu2 %795 }
 0x14e   : > { %v646_v16 = vmax.f32 %v615_v15, 0.0 }
 0x150   : > { %714 = vmatmul.f32.gmra.mxu2 %v646_v16  ;;  %v466_v16 = vld [vmem:[%s3040_s9 + $0x50] sm:$0xff] }
 0x153   : > { %v617_v19 = vpop.f32.mrf.mxu1 }
 0x154   : > { %v618_v20 = vadd.f32 %v617_v19, %v553_v17 }
 0x156   : > { %v647_v22 = vmax.f32 %v618_v20, 0.0 }
 0x158   : > { %717 = vmatmul.f32.gmra.mxu2 %v647_v22 }
 0x15b   : > { %v620_v25 = vpop.f32.mrf.mxu1 }
 0x15c   : > { %v621_v27 = vadd.f32 %v620_v25, %v556_v23  ;;  %v798_v23 = vpop.permute.xlu2 %797 }
 0x15e   : > { %v648_v56 = vmax.f32 %v621_v27, 0.0  ;;  %v467_v27 = vld [vmem:[%s3040_s9 + $0x58] sm:$0xff] }
 0x160   : > { %720 = vmatmul.f32.gmra.mxu2 %v648_v56 }
 0x163   : > { %v623_v29 = vpop.f32.mrf.mxu1 }
 0x164   : > { %v624_v30 = vadd.f32 %v623_v29, %v559_v28  ;;  %v800_v29 = vpop.permute.xlu1 %799 }
 0x166   : > { %v649_v31 = vmax.f32 %v624_v30, 0.0 }
 0x168   : > { %723 = vmatmul.f32.gmra.mxu2 %v649_v31  ;;  %v468_v31 = vld [vmem:[%s3040_s9 + $0x60] sm:$0xff] }
 0x16b   : > { %v626_v32 = vpop.f32.mrf.mxu1 }
 0x16c   : > { %v627_v33 = vadd.f32 %v626_v32, %v562_v60  ;;  %v469_v32 = vld [vmem:[%s3040_s9 + $0x68] sm:$0xff] }
 0x16e   : > { %v650_v34 = vmax.f32 %v627_v33, 0.0  ;;  %v934_v33 = vld [vmem:[%s4136_s6 + $0x18] sm:$0xff] }
 0x16f   : > { %1000 = vmatpush.msrb.mxu2 %v934_v33  ;;  %2323 = vmatpush.msra.mxu3 %v934_v33 }
 0x170   : > { %726 = vmatmul.f32.gmra.mxu2 %v650_v34  ;;  %v933_v34 = vld [vmem:[%s4136_s6 + $0x10] sm:$0xff] }
 0x171   : > { %1001 = vmatpush.msrb.mxu2 %v933_v34  ;;  %2324 = vmatpush.msra.mxu3 %v933_v34 }
 0x173   : > { %v629_v35 = vpop.f32.mrf.mxu1 }
 0x174   : > { %v630_v36 = vadd.f32 %v629_v35, %v565_v2  ;;  %v932_v2 = vld [vmem:[%s4136_s6 + $0x8] sm:$0xff] }
 0x175   : > { %1002 = vmatpush.msrb.mxu2 %v932_v2  ;;  %2325 = vmatpush.msra.mxu3 %v932_v2 }
 0x176   : > { %v651_v37 = vmax.f32 %v630_v36, 0.0  ;;  %v931_v36 = vld [vmem:[%s4136_s6] sm:$0xff] }
 0x177   : > { %1003 = vmatpush.msrb.mxu2 %v931_v36  ;;  %2326 = vmatpush.msra.mxu3 %v931_v36 }
 0x178   : > { %729 = vmatmul.f32.gmra.mxu2 %v651_v37 }
 0x17b   : > { %v632_v38 = vpop.f32.mrf.mxu1 }
 0x17c   : > { %v633_v39 = vadd.f32 %v632_v38, %v568_v8 }
 0x17e   : > { %v652_v40 = vmax.f32 %v633_v39, 0.0 }
 0x180   : > { %732 = vmatmul.f32.gmra.mxu2 %v652_v40 }
 0x183   : > { %v635_v41 = vpop.f32.mrf.mxu1 }
 0x184   : > { %v636_v42 = vadd.f32 %v635_v41, %v571_v14 }
 0x186   : > { %v653_v43 = vmax.f32 %v636_v42, 0.0 }
 0x188   : > { %735 = vmatmul.f32.gmra.mxu2 %v653_v43 }
 0x193   : > { %v691_v44 = vpop.f32.mrf.mxu2 }
 0x194   : > { %v3085_v45 = vadd.f32 %v3082_v18, %v691_v44 }
 0x196   : > { %v739_v21 = vmul.f32 1.442695, %v3085_v45 }
 0x198   : > { %2384 = vpow2.f32 %v739_v21 }
 0x19b   : > { %v694_v47 = vpop.f32.mrf.mxu2 }
 0x19c   : > { %v3089_v24 = vadd.f32 %v3082_v18, %v694_v47 }
 0x19e   : > { %v3091_v26 = vpop.eup %2384  ;;  %v741_v48 = vmul.f32 1.442695, %v3089_v24 }
 0x19f   : > { %v835_v49 = vmul.f32 %v3091_v26, %v788_v46  ;;  %v471_v46 = vld [vmem:[%s3040_s9 + $0x78] sm:$0xff] }
 0x1a0   : > { %2386 = vpow2.f32 %v741_v48 }
 0x1a1   : > { %867 = vrot.lane.b32.xlu0 %v835_v49, %s2680_s28 }
 0x1a3   : > { %v697_v50 = vpop.f32.mrf.mxu2 }
 0x1a4   : > { %v3097_v51 = vadd.f32 %v3082_v18, %v697_v50 }
 0x1a6   : > { %v3099_v53 = vpop.eup %2386  ;;  %v743_v55 = vmul.f32 1.442695, %v3097_v51 }
 0x1a7   : > { %v836_v57 = vmul.f32 %v3099_v53, %v790_v52 }
 0x1a8   : > { %2388 = vpow2.f32 %v743_v55 }
 0x1a9   : > { %869 = vrot.lane.b32.xlu2 %v836_v57, %s2680_s28  ;;  %801 = vrot.lane.b32.xlu0 %v463_v54, %s2679_s10 }
 0x1ab   : > { %v700_v59 = vpop.f32.mrf.mxu2 }
 0x1ac   : > { %v3107_v61 = vadd.f32 %v3082_v18, %v700_v59 }
 0x1ae   : > { %v3109_v62 = vpop.eup %2388  ;;  %v745_v0 = vmul.f32 1.442695, %v3107_v61 }
 0x1af   : > { %v837_v1 = vmul.f32 %v3109_v62, %v792_v58 }
 0x1b0   : > { %2390 = vpow2.f32 %v745_v0 }
 0x1b1   : > { %871 = vrot.lane.b32.xlu1 %v837_v1, %s2680_s28  ;;  %803 = vrot.lane.b32.xlu2 %v464_v63, %s2679_s10  ;;  %v470_v63 = vld [vmem:[%s3040_s9 + $0x70] sm:$0xff] }
 0x1b3   : > { %v703_v3 = vpop.f32.mrf.mxu2 }
 0x1b4   : > { %v3117_v4 = vadd.f32 %v3082_v18, %v703_v3 }
 0x1b6   : > { %v3119_v6 = vpop.eup %2390  ;;  %v747_v9 = vmul.f32 1.442695, %v3117_v4 }
 0x1b7   : > { %v838_v10 = vmul.f32 %v3119_v6, %v794_v5 }
 0x1b8   : > { %2392 = vpow2.f32 %v747_v9 }
 0x1b9   : > { %805 = vrot.lane.b32.xlu1 %v465_v7, %s2679_s10  ;;  %873 = vrot.lane.b32.xlu0 %v838_v10, %s2680_s28 }
 0x1bb   : > { %v706_v12 = vpop.f32.mrf.mxu2 }
 0x1bc   : > { %v3127_v13 = vadd.f32 %v3082_v18, %v706_v12 }
 0x1be   : > { %v3129_v15 = vpop.eup %2392  ;;  %v749_v17 = vmul.f32 1.442695, %v3127_v13 }
 0x1bf   : > { %v839_v19 = vmul.f32 %v3129_v15, %v796_v11 }
 0x1c0   : > { %2394 = vpow2.f32 %v749_v17 }
 0x1c1   : > { %875 = vrot.lane.b32.xlu2 %v839_v19, %s2680_s28  ;;  %807 = vrot.lane.b32.xlu0 %v466_v16, %s2679_s10 }
 0x1c3   : > { %v709_v20 = vpop.f32.mrf.mxu2 }
 0x1c4   : > { %v3137_v22 = vadd.f32 %v3082_v18, %v709_v20 }
 0x1c6   : > { %v3139_v25 = vpop.eup %2394  ;;  %v751_v56 = vmul.f32 1.442695, %v3137_v22 }
 0x1c7   : > { %v840_v28 = vmul.f32 %v3139_v25, %v798_v23 }
 0x1c8   : > { %2396 = vpow2.f32 %v751_v56 }
 0x1c9   : > { %877 = vrot.lane.b32.xlu1 %v840_v28, %s2680_s28  ;;  %809 = vrot.lane.b32.xlu2 %v467_v27, %s2679_s10 }
 0x1cb   : > { %v712_v35 = vpop.f32.mrf.mxu2 }
 0x1cc   : > { %v3174_v42 = vadd.f32 %v3082_v18, %v712_v35 }
 0x1ce   : > { %v3146_v30 = vpop.eup %2396  ;;  %v753_v44 = vmul.f32 1.442695, %v3174_v42 }
 0x1cf   : > { %v841_v60 = vmul.f32 %v3146_v30, %v800_v29 }
 0x1d1   : > { %811 = vrot.lane.b32.xlu1 %v468_v31, %s2679_s10  ;;  %879 = vrot.lane.b32.xlu0 %v841_v60, %s2680_s28 }
 0x1d3   : > { %v715_v37 = vpop.f32.mrf.mxu2 }
 0x1d4   : > { %v3167_v8 = vadd.f32 %v3082_v18, %v715_v37 }
 0x1d6   : > { %v755_v38 = vmul.f32 1.442695, %v3167_v8 }
 0x1d8   : > { %2398 = vpow2.f32 %v755_v38 }
 0x1d9   : > { %813 = vrot.lane.b32.xlu0 %v469_v32, %s2679_s10  ;;  %2400 = vpow2.f32 %v753_v44 }
 0x1db   : > { %v718_v43 = vpop.f32.mrf.mxu2 }
 0x1dc   : > { %v3187_v55 = vadd.f32 %v3082_v18, %v718_v43 }
 0x1de   : > { %v3170_v40 = vpop.eup %2398  ;;  %v757_v57 = vmul.f32 1.442695, %v3187_v55 }
 0x1df   : > { %v3182_v49 = vpop.eup %2400 }
 0x1e0   : > { %2402 = vpow2.f32 %v757_v57  ;;  %v1852_v57 = vmul.f32 %v3182_v49, %v3182_v49 }
 0x1e3   : > { %v721_v48 = vpop.f32.mrf.mxu2 }
 0x1e4   : > { %v3194_v0 = vadd.f32 %v3082_v18, %v721_v48  ;;  %v1100_v48 = vld [vmem:[#allocation4 + $0xf8] sm:$0xff] }
 0x1e5   : > { %1172 = vmatpush.msrb.mxu0 %v1100_v48  ;;  %v3285_v48 = vld [vmem:[%s4137_s7] ss:$0 sm:$0xff] }
 0x1e6   : > { %v759_v7 = vmul.f32 1.442695, %v3194_v0  ;;  %v3204_v10 = vpop.eup %2402 }
 0x1e8   : > { %2404 = vpow2.f32 %v759_v7  ;;  %v1082_v7 = vld [vmem:[#allocation4 + $0x68] sm:$0xff] }
 0x1eb   : > { %v724_v58 = vpop.f32.mrf.mxu2 }
 0x1ec   : > { %v3198_v3 = vadd.f32 %v3082_v18, %v724_v58  ;;  %v1090_v58 = vld [vmem:[#allocation4 + $0xa8] sm:$0xff] }
 0x1ee   : > { %v761_v9 = vmul.f32 1.442695, %v3198_v3  ;;  %v2405_v23 = vpop.eup %2404 }
 0x1f0   : > { %2406 = vpow2.f32 %v761_v9  ;;  %v1080_v9 = vld [vmem:[#allocation4 + $0x58] sm:$0xff] }
 0x1f3   : > { %v727_v19 = vpop.f32.mrf.mxu2 }
 0x1f4   : > { %v3215_v60 = vadd.f32 %v3082_v18, %v727_v19 }
 0x1f6   : > { %v3210_v27 = vpop.eup %2406  ;;  %v763_v32 = vmul.f32 1.442695, %v3215_v60 }
 0x1f8   : > { %2408 = vpow2.f32 %v763_v32  ;;  %v1070_v32 = vld [vmem:[#allocation4 + $0x8] sm:$0xff] }
 0x1fb   : > { %v730_v33 = vpop.f32.mrf.mxu2 }
 0x1fc   : > { %v3223_v35 = vadd.f32 %v3082_v18, %v730_v33 }
 0x1fe   : > { %v765_v36 = vmul.f32 1.442695, %v3223_v35  ;;  %v3227_v37 = vpop.eup %2408 }
 0x200   : > { %2410 = vpow2.f32 %v765_v36 }
 0x203   : > { %v870_v39 = vpop.permute.xlu2 %869 }
 0x204   : > { %v916_v52 = vadd.f32 %v870_v39, %v3089_v24 }
 0x206   : > { %v2411_v43 = vpop.eup %2410 }
 0x20b   : > { %v804_v14 = vpop.permute.xlu2 %803 }
 0x20c   : > { %v843_v41 = vmul.f32 %v3170_v40, %v804_v14 }
 0x20e   : > { %883 = vrot.lane.b32.xlu1 %v843_v41, %s2680_s28 }
 0x213   : > { %v868_v21 = vpop.permute.xlu0 %867 }
 0x214   : > { %v915_v47 = vadd.f32 %v868_v21, %v3085_v45 }
 0x216   : > { %817 = vrot.lane.b32.xlu1 %v471_v46, %s2679_s10  ;;  %2271 = vmatmul.msk.f32.vlgmr.msrb.gmra.mxu2 %vm939_vm0, %v915_v47  ;;  %v1845_v46 = vmul.f32 %v3091_v26, %v3091_v26  ;;  %v1849_v47 = vmul.f32 %v3129_v15, %v3129_v15  ;;  %v1092_v26 = vld [vmem:[#allocation4 + $0xb8] sm:$0xff]  ;;  %v1086_v15 = vld [vmem:[#allocation4 + $0x88] sm:$0xff] }
 0x21b   : > { %v802_v50 = vpop.permute.xlu0 %801  ;;  %v876_v5 = vpop.permute.xlu2 %875 }
 0x21c   : > { %v842_v54 = vmul.f32 %v3182_v49, %v802_v50  ;;  %v919_v28 = vadd.f32 %v876_v5, %v3117_v4  ;;  %v1098_v50 = vld [vmem:[#allocation4 + $0xe8] sm:$0xff]  ;;  %v1084_v5 = vld [vmem:[#allocation4 + $0x78] sm:$0xff] }
 0x21d   : > { %1173 = vmatpush.msrb.mxu0 %v1098_v50  ;;  %v1099_v50 = vld [vmem:[#allocation4 + $0xf0] sm:$0xff] }
 0x21e   : > { %2272 = vmatmul.msk.f32.gmra.mxu2 %vm939_vm0, %v916_v52  ;;  %881 = vrot.lane.b32.xlu2 %v842_v54, %s2680_s28  ;;  %v1096_v52 = vld [vmem:[#allocation4 + $0xd8] sm:$0xff]  ;;  %v1094_v54 = vld [vmem:[#allocation4 + $0xc8] sm:$0xff] }
 0x21f   : > { %1174 = vmatpush.msrb.mxu0 %v1096_v52  ;;  %1107 = vmatpush.msrb.mxu3 %v1099_v50  ;;  %v1961_v50 = vmul.f32 2.0, %v3117_v4 }
 0x221   : > { %1175 = vmatpush.msrb.mxu0 %v1094_v54 }
 0x223   : > { %v872_v59 = vpop.permute.xlu1 %871  ;;  %v810_v20 = vpop.permute.xlu2 %809  ;;  %1176 = vmatpush.msrb.mxu0 %v1092_v26  ;;  %v1969_v26 = vmul.f32 2.0, %v3215_v60 }
 0x224   : > { %v917_v1 = vadd.f32 %v872_v59, %v3097_v51  ;;  %v846_v29 = vmul.f32 %v3210_v27, %v810_v20  ;;  %v1088_v59 = vld [vmem:[#allocation4 + $0x98] sm:$0xff] }
 0x225   : > { %1177 = vmatpush.msrb.mxu0 %v1090_v58  ;;  %v1097_v58 = vld [vmem:[#allocation4 + $0xe0] sm:$0xff] }
 0x226   : > { %2273 = vmatmul.msk.f32.gmra.mxu2 %vm939_vm0, %v917_v1  ;;  %815 = vrot.lane.b32.xlu2 %v470_v63, %s2679_s10  ;;  %v1855_v63 = vmul.f32 %v2405_v23, %v2405_v23  ;;  %v733_v1 = vpop.f32.mrf.mxu2  ;;  %s4151_s10 = sld [smem:[#allocation9_spill]] }
 0x227   : > { %1178 = vmatpush.msrb.mxu0 %v1088_v59  ;;  %v3245_v49 = vadd.f32 %v3082_v18, %v733_v1  ;;  %1108 = vmatpush.msrb.mxu3 %v1097_v58 }
 0x229   : > { %1179 = vmatpush.msrb.mxu0 %v1086_v15  ;;  %v1853_v15 = vmul.f32 %v3170_v40, %v3170_v40 }
 0x22b   : > { %v806_v11 = vpop.permute.xlu1 %805  ;;  %v874_v12 = vpop.permute.xlu0 %873  ;;  %1180 = vmatpush.msrb.mxu0 %v1084_v5  ;;  %v1095_v5 = vld [vmem:[#allocation4 + $0xd0] sm:$0xff] }
 0x22c   : > { %v844_v16 = vmul.f32 %v3204_v10, %v806_v11  ;;  %v918_v17 = vadd.f32 %v874_v12, %v3107_v61  ;;  %v1078_v11 = vld [vmem:[#allocation4 + $0x48] sm:$0xff]  ;;  %v1858_v12 = vmul.f32 %v2411_v43, %v2411_v43  ;;  %1109 = vmatpush.msrb.mxu3 %v1095_v5 }
 0x22d   : > { %1181 = vmatpush.msrb.mxu0 %v1082_v7 }
 0x22e   : > { %885 = vrot.lane.b32.xlu0 %v844_v16, %s2680_s28  ;;  %2274 = vmatmul.msk.f32.gmra.mxu2 %vm939_vm0, %v918_v17  ;;  %v767_v16 = vmul.f32 1.442695, %v3245_v49  ;;  %v1076_v17 = vld [vmem:[#allocation4 + $0x38] sm:$0xff]  ;;  %v736_v19 = vpop.f32.mrf.mxu2 }
 0x22f   : > { %1182 = vmatpush.msrb.mxu0 %v1080_v9 }
 0x230   : > { %2412 = vpow2.f32 %v767_v16 }
 0x231   : > { %1183 = vmatpush.msrb.mxu0 %v1078_v11  ;;  %v1856_v11 = vmul.f32 %v3210_v27, %v3210_v27 }
 0x233   : > { %v808_v56 = vpop.permute.xlu0 %807  ;;  %1184 = vmatpush.msrb.mxu0 %v1076_v17 }
 0x234   : > { %v845_v31 = vmul.f32 %v2405_v23, %v808_v56  ;;  %v1074_v56 = vld [vmem:[#allocation4 + $0x28] sm:$0xff] }
 0x235   : > { %1185 = vmatpush.msrb.mxu0 %v1074_v56 }
 0x236   : > { %889 = vrot.lane.b32.xlu0 %v846_v29, %s2680_s28  ;;  %2275 = vmatmul.msk.f32.gmra.mxu2 %vm939_vm0, %v919_v28  ;;  %v3251_v28 = vadd.f32 %v3082_v18, %v736_v19  ;;  %v1072_v29 = vld [vmem:[#allocation4 + $0x18] sm:$0xff]  ;;  %v1093_v19 = vld [vmem:[#allocation4 + $0xc0] sm:$0xff] }
 0x237   : > { %887 = vrot.lane.b32.xlu2 %v845_v31, %s2680_s28  ;;  %v1957_v31 = vmul.f32 2.0, %v3085_v45  ;;  %1186 = vmatpush.msrb.mxu0 %v1072_v29  ;;  %v1959_v29 = vmul.f32 2.0, %v3097_v51 }
 0x238   : > { %v769_v33 = vmul.f32 1.442695, %v3251_v28  ;;  %v1972_v9 = vmul.f32 2.0, %v3251_v28  ;;  %1110 = vmatpush.msrb.mxu3 %v1093_v19  ;;  %v1970_v19 = vmul.f32 2.0, %v3223_v35 }
 0x239   : > { %1187 = vmatpush.msrb.mxu0 %v1070_v32 }
 0x23a   : > { %2414 = vpow2.f32 %v769_v33  ;;  %v1089_v33 = vld [vmem:[#allocation4 + $0xa0] sm:$0xff] }
 0x23b   : > { %v878_v34 = vpop.permute.xlu1 %877 }
 0x23c   : > { %v920_v2 = vadd.f32 %v878_v34, %v3127_v13  ;;  %v3257_v34 = vpop.eup %2412 }
 0x23d   : > { %v1859_v56 = vmul.f32 %v3257_v34, %v3257_v34 }
 0x23e   : > { %2276 = vmatmul.msk.f32.vlgmr.msra.gmra.mxu3 %vm939_vm0, %v920_v2 }
 0x243   : > { %v812_v38 = vpop.permute.xlu1 %811  ;;  %v880_v39 = vpop.permute.xlu0 %879 }
 0x244   : > { %v847_v14 = vmul.f32 %v3227_v37, %v812_v38  ;;  %v921_v41 = vadd.f32 %v880_v39, %v3137_v22  ;;  %v1960_v39 = vmul.f32 2.0, %v3107_v61 }
 0x246   : > { %891 = vrot.lane.b32.xlu1 %v847_v14, %s2680_s28  ;;  %2277 = vmatmul.msk.f32.gmra.mxu3 %vm939_vm0, %v921_v41  ;;  %v3265_v14 = vpop.eup %2414 }
 0x24b   : > { %v814_v44 = vpop.permute.xlu0 %813 }
 0x24c   : > { %v848_v21 = vmul.f32 %v2411_v43, %v814_v44  ;;  %v1846_v44 = vmul.f32 %v3099_v53, %v3099_v53  ;;  %v1966_v53 = vmul.f32 2.0, %v3187_v55 }
 0x24e   : > { %893 = vrot.lane.b32.xlu2 %v848_v21, %s2680_s28  ;;  %v1963_v21 = vmul.f32 2.0, %v3137_v22 }
 0x256   : > { %1877 = vrot.lane.b32.xlu2 %v1845_v46, %s2680_s28  ;;  %v1847_v46 = vmul.f32 %v3109_v62, %v3109_v62  ;;  %v1850_v62 = vmul.f32 %v3139_v25, %v3139_v25 }
 0x25e   : > { %1885 = vrot.lane.b32.xlu2 %v1849_v47, %s2680_s28  ;;  %v1848_v47 = vmul.f32 %v3119_v6, %v3119_v6  ;;  %v1851_v6 = vmul.f32 %v3146_v30, %v3146_v30 }
 0x266   : > { %1891 = vrot.lane.b32.xlu2 %v1852_v57, %s2680_s28 }
 0x26e   : > { %1897 = vrot.lane.b32.xlu2 %v1855_v63, %s2680_s28  ;;  %v1854_v63 = vmul.f32 %v3204_v10, %v3204_v10 }
 0x276   : > { %1903 = vrot.lane.b32.xlu2 %v1858_v12, %s2680_s28  ;;  %v1857_v12 = vmul.f32 %v3227_v37, %v3227_v37 }
 0x278   : > { %v882_v20 = vpop.permute.xlu2 %881 }
 0x279   : > { %v922_v23 = vadd.f32 %v882_v20, %v3174_v42 }
 0x27b   : > { %2278 = vmatmul.msk.f32.gmra.mxu3 %vm939_vm0, %v922_v23  ;;  %v1091_v23 = vld [vmem:[#allocation4 + $0xb0] sm:$0xff] }
 0x27c   : > { %1111 = vmatpush.msrb.mxu3 %v1091_v23  ;;  %v1860_v23 = vmul.f32 %v3265_v14, %v3265_v14 }
 0x27e   : > { %1989 = vrot.lane.b32.xlu2 %v1957_v31, %s2680_s28  ;;  %1112 = vmatpush.msrb.mxu3 %v1089_v33 }
 0x280   : > { %v884_v2 = vpop.permute.xlu1 %883  ;;  %v816_v36 = vpop.permute.xlu2 %815 }
 0x281   : > { %v923_v18 = vadd.f32 %v884_v2, %v3167_v8  ;;  %v849_v38 = vmul.f32 %v3257_v34, %v816_v36 }
 0x283   : > { %895 = vrot.lane.b32.xlu0 %v849_v38, %s2680_s28  ;;  %2279 = vmatmul.msk.f32.gmra.mxu3 %vm939_vm0, %v923_v18  ;;  %v1958_v38 = vmul.f32 2.0, %v3089_v24 }
 0x286   : > { %1995 = vrot.lane.b32.xlu2 %v1960_v39, %s2680_s28  ;;  %v1962_v39 = vmul.f32 2.0, %v3127_v13 }
 0x288   : > { %v818_v41 = vpop.permute.xlu1 %817 }
 0x289   : > { %v850_v43 = vmul.f32 %v3265_v14, %v818_v41  ;;  %v1087_v41 = vld [vmem:[#allocation4 + $0x90] sm:$0xff] }
 0x28a   : > { %1113 = vmatpush.msrb.mxu3 %v1087_v41 }
 0x28b   : > { %897 = vrot.lane.b32.xlu1 %v850_v43, %s2680_s28  ;;  %1879 = vrot.lane.b32.xlu0 %v1846_v44, %s2680_s28  ;;  %v1085_v44 = vld [vmem:[#allocation4 + $0x80] sm:$0xff] }
 0x28c   : > { %1114 = vmatpush.msrb.mxu3 %v1085_v44 }
 0x28e   : > { %2001 = vrot.lane.b32.xlu2 %v1963_v21, %s2680_s28 }
 0x291   : > { %v888_v40 = vpop.permute.xlu2 %887 }
 0x292   : > { %v925_v16 = vadd.f32 %v888_v40, %v3194_v0  ;;  %v1077_v40 = vld [vmem:[#allocation4 + $0x40] sm:$0xff] }
 0x293   : > { %1881 = vrot.lane.b32.xlu1 %v1847_v46, %s2680_s28  ;;  %1883 = vrot.lane.b32.xlu0 %v1848_v47, %s2680_s28  ;;  %v1083_v47 = vld [vmem:[#allocation4 + $0x70] sm:$0xff] }
 0x294   : > { %1115 = vmatpush.msrb.mxu3 %v1083_v47 }
 0x296   : > { %2007 = vrot.lane.b32.xlu2 %v1966_v53, %s2680_s28 }
 0x299   : > { %v1005_v52 = vpop.f32.mrf.mxu2 }
 0x29a   : > { %v3292_v54 = vadd.f32 %v3285_v48, %v1005_v52  ;;  %v1965_v52 = vmul.f32 2.0, %v3167_v8 }
 0x29b   : > { %1887 = vrot.lane.b32.xlu1 %v1850_v62, %s2680_s28  ;;  %1889 = vrot.lane.b32.xlu0 %v1851_v6, %s2680_s28 }
 0x29c   : > { %v1053_v57 = vmax.f32 %v3292_v54, 0.0 }
 0x29e   : > { %1188 = vmatmul.f32.vlgmr.msrb.gmra.mxu0 %v1053_v57  ;;  %2013 = vrot.lane.b32.xlu2 %v1969_v26, %s2680_s28 }
 0x2a0   : > { %v886_v25 = vpop.permute.xlu0 %885 }
 0x2a1   : > { %v924_v30 = vadd.f32 %v886_v25, %v3187_v55  ;;  %v1008_v59 = vpop.f32.mrf.mxu2  ;;  %v1081_v25 = vld [vmem:[#allocation4 + $0x60] sm:$0xff] }
 0x2a2   : > { %v3307_v1 = vadd.f32 %v3285_v48, %v1008_v59  ;;  %v1964_v59 = vmul.f32 2.0, %v3174_v42  ;;  %1116 = vmatpush.msrb.mxu3 %v1081_v25 }
 0x2a3   : > { %1893 = vrot.lane.b32.xlu1 %v1853_v15, %s2680_s28  ;;  %1895 = vrot.lane.b32.xlu0 %v1854_v63, %s2680_s28  ;;  %v1968_v15 = vmul.f32 2.0, %v3198_v3  ;;  %v1079_v63 = vld [vmem:[#allocation4 + $0x50] sm:$0xff] }
 0x2a4   : > { %v1054_v7 = vmax.f32 %v3307_v1, 0.0  ;;  %2280 = vmatmul.msk.f32.gmra.mxu3 %vm939_vm0, %v924_v30 }
 0x2a5   : > { %1117 = vmatpush.msrb.mxu3 %v1079_v63 }
 0x2a6   : > { %1191 = vmatmul.f32.gmra.mxu0 %v1054_v7  ;;  %2019 = vrot.lane.b32.xlu2 %v1972_v9, %s2680_s28 }
 0x2a7   : > { %1118 = vmatpush.msrb.mxu3 %v1077_v40 }
 0x2a8   : > { %v890_v27 = vpop.permute.xlu0 %889  ;;  %v894_v46 = vpop.permute.xlu2 %893 }
 0x2a9   : > { %v1011_v10 = vpop.f32.mrf.mxu2  ;;  %v926_v31 = vadd.f32 %v890_v27, %v3198_v3  ;;  %v928_v62 = vadd.f32 %v894_v46, %v3223_v35 }
 0x2aa   : > { %v3323_v17 = vadd.f32 %v3285_v48, %v1011_v10  ;;  %v1967_v10 = vmul.f32 2.0, %v3194_v0 }
 0x2ab   : > { %1899 = vrot.lane.b32.xlu1 %v1856_v11, %s2680_s28  ;;  %1901 = vrot.lane.b32.xlu0 %v1857_v12, %s2680_s28  ;;  %v1971_v11 = vmul.f32 2.0, %v3245_v49 }
 0x2ac   : > { %v1055_v20 = vmax.f32 %v3323_v17, 0.0  ;;  %2281 = vmatmul.msk.f32.gmra.mxu3 %vm939_vm0, %v925_v16  ;;  %v1075_v16 = vld [vmem:[#allocation4 + $0x30] sm:$0xff] }
 0x2ad   : > { %1119 = vmatpush.msrb.mxu3 %v1075_v16  ;;  %v1835_v16 = vmul.f32 %v3137_v22, %v3137_v22 }
 0x2ae   : > { %1194 = vmatmul.f32.gmra.mxu0 %v1055_v20 }
 0x2b0   : > { %v1878_v58 = vpop.permute.xlu2 %1877 }
 0x2b1   : > { %v1014_v37 = vpop.f32.mrf.mxu2 }
 0x2b2   : > { %v3336_v32 = vadd.f32 %v3285_v48, %v1014_v37  ;;  %v1073_v37 = vld [vmem:[#allocation4 + $0x20] sm:$0xff] }
 0x2b3   : > { %1905 = vrot.lane.b32.xlu1 %v1859_v56, %s2680_s28  ;;  %1993 = vrot.lane.b32.xlu0 %v1959_v29, %s2680_s28  ;;  %v1071_v56 = vld [vmem:[#allocation4 + $0x10] sm:$0xff] }
 0x2b4   : > { %v1056_v2 = vmax.f32 %v3336_v32, 0.0  ;;  %2282 = vmatmul.msk.f32.gmra.mxu3 %vm939_vm0, %v926_v31  ;;  %v1069_v31 = vld [vmem:[#allocation4] sm:$0xff] }
 0x2b5   : > { %1120 = vmatpush.msrb.mxu3 %v1073_v37 }
 0x2b6   : > { %1197 = vmatmul.f32.gmra.mxu0 %v1056_v2 }
 0x2b7   : > { %1121 = vmatpush.msrb.mxu3 %v1071_v56 }
 0x2b8   : > { %v892_v34 = vpop.permute.xlu1 %891  ;;  %v3380_v12 = vpop.permute.xlu2 %1885 }
 0x2b9   : > { %v927_v36 = vadd.f32 %v892_v34, %v3215_v60  ;;  %v1017_v18 = vpop.f32.mrf.mxu2  ;;  %1122 = vmatpush.msrb.mxu3 %v1069_v31 }
 0x2ba   : > { %v3348_v43 = vadd.f32 %v3285_v48, %v1017_v18 }
 0x2bb   : > { %1991 = vrot.lane.b32.xlu1 %v1958_v38, %s2680_s28  ;;  %1999 = vrot.lane.b32.xlu0 %v1962_v39, %s2680_s28 }
 0x2bc   : > { %v1057_v21 = vmax.f32 %v3348_v43, 0.0  ;;  %2283 = vmatmul.msk.f32.gmra.mxu3 %vm939_vm0, %v927_v36  ;;  %v1829_v36 = vmul.f32 %v3085_v45, %v3085_v45  ;;  %v1837_v43 = vmul.f32 %v3167_v8, %v3167_v8 }
 0x2be   : > { %1200 = vmatmul.f32.gmra.mxu0 %v1057_v21  ;;  %v1925_v18 = vadd.f32 %v1878_v58, %v1829_v36  ;;  %v1832_v58 = vmul.f32 %v3107_v61, %v3107_v61 }
 0x2c0   : > { %v3389_v27 = vpop.permute.xlu2 %1891  ;;  %v2287_v44 = vadd.f32 -1.0, %v1925_v18 }
 0x2c1   : > { %v1020_v53 = vpop.f32.mrf.mxu3 }
 0x2c2   : > { %v3360_v6 = vadd.f32 %v3285_v48, %v1020_v53 }
 0x2c3   : > { %1997 = vrot.lane.b32.xlu1 %v1961_v50, %s2680_s28  ;;  %2005 = vrot.lane.b32.xlu0 %v1965_v52, %s2680_s28 }
 0x2c4   : > { %2284 = vmatmul.msk.f32.gmra.mxu3 %vm939_vm0, %v928_v62  ;;  %v1058_v26 = vmax.f32 %v3360_v6, 0.0  ;;  %v1840_v6 = vmul.f32 %v3198_v3, %v3198_v3 }
 0x2c6   : > { %1203 = vmatmul.f32.gmra.mxu0 %v1058_v26 }
 0x2c8   : > { %v3391_v29 = vpop.permute.xlu2 %1897 }
 0x2c9   : > { %v1023_v30 = vpop.f32.mrf.mxu3 }
 0x2ca   : > { %v3371_v5 = vadd.f32 %v3285_v48, %v1023_v30 }
 0x2cb   : > { %2003 = vrot.lane.b32.xlu1 %v1964_v59, %s2680_s28  ;;  %2011 = vrot.lane.b32.xlu0 %v1968_v15, %s2680_s28 }
 0x2cc   : > { %v1059_v9 = vmax.f32 %v3371_v5, 0.0 }
 0x2ce   : > { %1206 = vmatmul.f32.gmra.mxu0 %v1059_v9 }
 0x2d0   : > { %v3393_v33 = vpop.permute.xlu2 %1903 }
 0x2d3   : > { %2009 = vrot.lane.b32.xlu1 %v1967_v10, %s2680_s28  ;;  %2017 = vrot.lane.b32.xlu0 %v1971_v11, %s2680_s28 }
 0x2d8   : > { %v1990_v38 = vpop.permute.xlu2 %1989 }
 0x2d9   : > { %v2037_v50 = vsub.f32 %v2287_v44, %v1990_v38 }
 0x2db   : > { %2015 = vrot.lane.b32.xlu1 %v1970_v19, %s2680_s28  ;;  %1907 = vrot.lane.b32.xlu0 %v1860_v23, %s2680_s28  ;;  %v2053_v62 = vsel %vm939_vm0, %v2037_v50, 0.0  ;;  %s4182_s28 = sld [smem:[#allocation10_spill]] }
 0x2e0   : > { %v1996_v45 = vpop.permute.xlu2 %1995 }
 0x2e1   : > { %s4057_s22 = scalar_lea.vmem %s4182_s28, %s2268_s21 }
 0x2e8   : > { %v2002_v37 = vpop.permute.xlu2 %2001 }
 0x2f0   : > { %v2008_v22 = vpop.permute.xlu2 %2007 }
 0x2f5   : > { %v896_v34 = vpop.permute.xlu0 %895 }
 0x2f6   : > { %v929_v14 = vadd.f32 %v896_v34, %v3245_v49  ;;  %v1838_v34 = vmul.f32 %v3187_v55, %v3187_v55  ;;  %v1831_v55 = vmul.f32 %v3097_v51, %v3097_v51  ;;  %v1834_v51 = vmul.f32 %v3127_v13, %v3127_v13 }
 0x2f8   : > { %2285 = vmatmul.msk.f32.gmra.mxu3 %vm939_vm0, %v929_v14  ;;  %v2014_v17 = vpop.permute.xlu2 %2013 }
 0x2fd   : > { %v898_v39 = vpop.permute.xlu1 %897  ;;  %v3399_v41 = vpop.permute.xlu0 %1879 }
 0x2fe   : > { %v930_v46 = vadd.f32 %v898_v39, %v3251_v28  ;;  %v1026_v47 = vpop.f32.mrf.mxu3 }
 0x2ff   : > { %v3403_v53 = vadd.f32 %v3285_v48, %v1026_v47 }
 0x300   : > { %2286 = vmatmul.msk.f32.gmra.mxu3 %vm939_vm0, %v930_v46 }
 0x301   : > { %v1060_v52 = vmax.f32 %v3403_v53, 0.0 }
 0x303   : > { %1209 = vmatmul.f32.gmra.mxu0 %v1060_v52 }
 0x305   : > { %v1882_v25 = vpop.permute.xlu1 %1881  ;;  %2054 = vadd.xlane.f32.xlu1 %v2053_v62  ;;  %v1884_v30 = vpop.permute.xlu0 %1883 }
 0x306   : > { %v1928_v59 = vadd.f32 %v1884_v30, %v1832_v58  ;;  %v1029_v15 = vpop.f32.mrf.mxu3  ;;  %v1927_v50 = vadd.f32 %v1882_v25, %v1831_v55 }
 0x307   : > { %v3413_v63 = vadd.f32 %v3285_v48, %v1029_v15 }
 0x308   : > { %v2290_v40 = vadd.f32 -1.0, %v1928_v59  ;;  %1123 = vmatmul.f32.vlgmr.msrb.gmra.mxu3 %v1053_v57  ;;  %v2289_v62 = vadd.f32 -1.0, %v1927_v50 }
 0x309   : > { %v1061_v10 = vmax.f32 %v3413_v63, 0.0 }
 0x30a   : > { %v2040_v11 = vsub.f32 %v2290_v40, %v1996_v45 }
 0x30b   : > { %1212 = vmatmul.f32.gmra.mxu0 %v1061_v10 }
 0x30c   : > { %v2062_v61 = vsel %vm939_vm0, %v2040_v11, 0.0 }
 0x30d   : > { %v1888_v19 = vpop.permute.xlu1 %1887  ;;  %2063 = vadd.xlane.f32.xlu1 %v2062_v61  ;;  %v1890_v23 = vpop.permute.xlu0 %1889 }
 0x30e   : > { %v1931_v56 = vadd.f32 %v1890_v23, %v1835_v16  ;;  %v1930_v40 = vadd.f32 %v1888_v19, %v1834_v51 }
 0x310   : > { %v2293_v31 = vadd.f32 -1.0, %v1931_v56  ;;  %1126 = vmatmul.f32.gmra.mxu3 %v1054_v7  ;;  %v1841_v7 = vmul.f32 %v3215_v60, %v3215_v60  ;;  %v1830_v60 = vmul.f32 %v3089_v24, %v3089_v24  ;;  %v2292_v13 = vadd.f32 -1.0, %v1930_v40 }
 0x312   : > { %v2043_v54 = vsub.f32 %v2293_v31, %v2002_v37 }
 0x314   : > { %v2071_v57 = vsel %vm939_vm0, %v2043_v54, 0.0 }
 0x315   : > { %v1894_v14 = vpop.permute.xlu1 %1893  ;;  %2072 = vadd.xlane.f32.xlu1 %v2071_v57  ;;  %v1896_v36 = vpop.permute.xlu0 %1895 }
 0x316   : > { %v1934_v18 = vadd.f32 %v1896_v36, %v1838_v34  ;;  %v1933_v57 = vadd.f32 %v1894_v14, %v1837_v43 }
 0x318   : > { %v2296_v38 = vadd.f32 -1.0, %v1934_v18  ;;  %1129 = vmatmul.f32.gmra.mxu3 %v1055_v20  ;;  %v2295_v8 = vadd.f32 -1.0, %v1933_v57 }
 0x31a   : > { %v2046_v39 = vsub.f32 %v2296_v38, %v2008_v22 }
 0x31c   : > { %v2080_v44 = vsel %vm939_vm0, %v2046_v39, 0.0 }
 0x31d   : > { %v1900_v1 = vpop.permute.xlu1 %1899  ;;  %2081 = vadd.xlane.f32.xlu1 %v2080_v44  ;;  %v1902_v46 = vpop.permute.xlu0 %1901 }
 0x31e   : > { %v1937_v47 = vadd.f32 %v1902_v46, %v1841_v7  ;;  %v1936_v46 = vadd.f32 %v1900_v1, %v1840_v6 }
 0x320   : > { %1132 = vmatmul.f32.gmra.mxu3 %v1056_v2  ;;  %v2299_v45 = vadd.f32 -1.0, %v1937_v47  ;;  %v1926_v2 = vadd.f32 %v3399_v41, %v1830_v60  ;;  %v1833_v41 = vmul.f32 %v3117_v4, %v3117_v4  ;;  %v2298_v3 = vadd.f32 -1.0, %v1936_v46 }
 0x322   : > { %v2049_v20 = vsub.f32 %v2299_v45, %v2014_v17  ;;  %v2288_v24 = vadd.f32 -1.0, %v1926_v2  ;;  %v1929_v56 = vadd.f32 %v3380_v12, %v1833_v41  ;;  %v1836_v12 = vmul.f32 %v3174_v42, %v3174_v42 }
 0x324   : > { %v2089_v30 = vsel %vm939_vm0, %v2049_v20, 0.0  ;;  %v2291_v36 = vadd.f32 -1.0, %v1929_v56  ;;  %v1932_v14 = vadd.f32 %v3389_v27, %v1836_v12  ;;  %v1839_v27 = vmul.f32 %v3194_v0, %v3194_v0 }
 0x325   : > { %v3437_v58 = vpop.permute.xlu1 %1905  ;;  %v1994_v59 = vpop.permute.xlu0 %1993  ;;  %2090 = vadd.xlane.f32.xlu1 %v2089_v30 }
 0x326   : > { %v2039_v15 = vsub.f32 %v2289_v62, %v1994_v59  ;;  %v2294_v47 = vadd.f32 -1.0, %v1932_v14 }
 0x327   : > { %v1032_v32 = vpop.f32.mrf.mxu3 }
 0x328   : > { %v3446_v25 = vadd.f32 %v3285_v48, %v1032_v32  ;;  %1135 = vmatmul.f32.gmra.mxu3 %v1057_v21  ;;  %v2059_v11 = vsel %vm939_vm0, %v2039_v15, 0.0 }
 0x329   : > { %2060 = vadd.xlane.f32.xlu2 %v2059_v11  ;;  %v1101_v11 = vld [vmem:[%s4151_s10] sm:$0x3] }
 0x32a   : > { %v1062_v61 = vmax.f32 %v3446_v25, 0.0  ;;  %v3491_v63 = vperm.slane %v1101_v11, 1 }
 0x32c   : > { %1215 = vmatmul.f32.gmra.mxu0 %v1062_v61 }
 0x32d   : > { %v1992_v16 = vpop.permute.xlu1 %1991  ;;  %v2000_v23 = vpop.permute.xlu0 %1999 }
 0x32e   : > { %v2038_v37 = vsub.f32 %v2288_v24, %v1992_v16  ;;  %v2042_v21 = vsub.f32 %v2292_v13, %v2000_v23 }
 0x32f   : > { %v1035_v19 = vpop.f32.mrf.mxu3 }
 0x330   : > { %v1036_v31 = vadd.f32 %v3285_v48, %v1035_v19  ;;  %1138 = vmatmul.f32.gmra.mxu3 %v1058_v26  ;;  %v2056_v54 = vsel %vm939_vm0, %v2038_v37, 0.0  ;;  %v2068_v34 = vsel %vm939_vm0, %v2042_v21, 0.0 }
 0x331   : > { %2057 = vadd.xlane.f32.xlu0 %v2056_v54  ;;  %2069 = vadd.xlane.f32.xlu2 %v2068_v34 }
 0x332   : > { %v1063_v4 = vmax.f32 %v1036_v31, 0.0 }
 0x334   : > { %1218 = vmatmul.f32.gmra.mxu0 %v1063_v4 }
 0x335   : > { %v1998_v18 = vpop.permute.xlu1 %1997  ;;  %v2006_v22 = vpop.permute.xlu0 %2005 }
 0x336   : > { %v2041_v38 = vsub.f32 %v2291_v36, %v1998_v18  ;;  %v2045_v26 = vsub.f32 %v2295_v8, %v2006_v22 }
 0x337   : > { %v1038_v39 = vpop.f32.mrf.mxu3 }
 0x338   : > { %v1039_v44 = vadd.f32 %v3285_v48, %v1038_v39  ;;  %1141 = vmatmul.f32.gmra.mxu3 %v1059_v9  ;;  %v2065_v7 = vsel %vm939_vm0, %v2041_v38, 0.0  ;;  %v2077_v55 = vsel %vm939_vm0, %v2045_v26, 0.0  ;;  %v1935_v9 = vadd.f32 %v3391_v29, %v1839_v27 }
 0x339   : > { %2066 = vadd.xlane.f32.xlu0 %v2065_v7  ;;  %2078 = vadd.xlane.f32.xlu2 %v2077_v55 }
 0x33a   : > { %v1064_v42 = vmax.f32 %v1039_v44, 0.0  ;;  %v2297_v60 = vadd.f32 -1.0, %v1935_v9  ;;  %v3516_v44 = vperm.slane %v1101_v11, 0 }
 0x33c   : > { %1221 = vmatmul.f32.gmra.mxu0 %v1064_v42 }
 0x33d   : > { %v2004_v50 = vpop.permute.xlu1 %2003  ;;  %v2012_v45 = vpop.permute.xlu0 %2011 }
 0x33e   : > { %v2044_v17 = vsub.f32 %v2294_v47, %v2004_v50  ;;  %v2048_v20 = vsub.f32 %v2298_v3, %v2012_v45 }
 0x33f   : > { %v1041_v5 = vpop.f32.mrf.mxu3 }
 0x340   : > { %v1042_v1 = vadd.f32 %v3285_v48, %v1041_v5  ;;  %1144 = vmatmul.f32.gmra.mxu3 %v1060_v52  ;;  %v2074_v62 = vsel %vm939_vm0, %v2044_v17, 0.0  ;;  %v2086_v30 = vsel %vm939_vm0, %v2048_v20, 0.0  ;;  %v1189_v52 = vpop.f32.mrf.mxu0 }
 0x341   : > { %2075 = vadd.xlane.f32.xlu0 %v2074_v62  ;;  %2087 = vadd.xlane.f32.xlu2 %v2086_v30 }
 0x342   : > { %v1065_v59 = vmax.f32 %v1042_v1, 0.0 }
 0x344   : > { %1224 = vmatmul.f32.gmra.mxu0 %v1065_v59 }
 0x345   : > { %v2010_v0 = vpop.permute.xlu1 %2009 }
 0x346   : > { %v2047_v51 = vsub.f32 %v2297_v60, %v2010_v0 }
 0x347   : > { %v1044_v15 = vpop.f32.mrf.mxu3 }
 0x348   : > { %v1045_v32 = vadd.f32 %v3285_v48, %v1044_v15  ;;  %1147 = vmatmul.f32.gmra.mxu3 %v1061_v10  ;;  %v2083_v29 = vsel %vm939_vm0, %v2047_v51, 0.0  ;;  %v1192_v2 = vpop.f32.mrf.mxu0  ;;  %v3494_v10 = vadd.f32 %v1189_v52, %v3491_v63 }
 0x349   : > { %2084 = vadd.xlane.f32.xlu0 %v2083_v29  ;;  %v3497_v24 = vadd.f32 %v1192_v2, %v3491_v63 }
 0x34a   : > { %v1066_v53 = vmax.f32 %v1045_v32, 0.0  ;;  %v1238_v62 = vmax.f32 %v3494_v10, 0.0  ;;  %v2544_v32 = vld [vmem:[%s2822_s13 + $0x8] sm:$0xff] }
 0x34b   : > { %v1272_v13 = vand.u32 2147483647, %v3497_v24  ;;  %v3538_v29 = vmul.f32 %v2544_v32, %v3494_v10  ;;  %v2547_v32 = vld [vmem:[%s2822_s13 + $0x38] sm:$0xff] }
 0x34c   : > { %1227 = vmatmul.f32.gmra.mxu0 %v1066_v53 }
 0x34d   : > { %v1304_v41 = vsub.f32 0.0, %v1272_v13 }
 0x34f   : > { %v1339_v19 = vmul.f32 1.442695, %v1304_v41  ;;  %v2545_v41 = vld [vmem:[%s2822_s13 + $0x18] sm:$0xff] }
 0x350   : > { %1150 = vmatmul.f32.gmra.mxu3 %v1062_v61  ;;  %v1195_v40 = vpop.f32.mrf.mxu0  ;;  %v1270_v61 = vand.u32 2147483647, %v3494_v10  ;;  %v3550_v10 = vmul.f32 %v2545_v41, %v3497_v24 }
 0x351   : > { %v3502_v16 = vadd.f32 %v1195_v40, %v3491_v63 }
 0x352   : > { %v1302_v23 = vsub.f32 0.0, %v1270_v61 }
 0x353   : > { %v1274_v37 = vand.u32 2147483647, %v3502_v16 }
 0x354   : > { %v1335_v43 = vmul.f32 1.442695, %v1302_v23  ;;  %v1240_v23 = vmax.f32 %v3497_v24, 0.0 }
 0x355   : > { %v1306_v56 = vsub.f32 0.0, %v1274_v37 }
 0x356   : > { %2416 = vpow2.f32 %v1335_v43 }
 0x357   : > { %2418 = vpow2.f32 %v1339_v19 }
 0x358   : > { %1153 = vmatmul.f32.gmra.mxu3 %v1063_v4  ;;  %v1198_v25 = vpop.f32.mrf.mxu0  ;;  %v1343_v4 = vmul.f32 1.442695, %v1306_v56 }
 0x359   : > { %v3507_v57 = vadd.f32 %v1198_v25, %v3491_v63 }
 0x35a   : > { %2420 = vpow2.f32 %v1343_v4 }
 0x35b   : > { %v1276_v36 = vand.u32 2147483647, %v3507_v57 }
 0x35c   : > { %v2417_v18 = vpop.eup %2416 }
 0x35d   : > { %v3511_v38 = vpop.eup %2418  ;;  %v1308_v6 = vsub.f32 0.0, %v1276_v36  ;;  %v1406_v14 = vadd.f32 1.0, %v2417_v18  ;;  %v1409_v50 = vmul.f32 -0.5, %v2417_v18  ;;  %v1412_v52 = vand.u32 2147483647, %v2417_v18 }
 0x35e   : > { %v1424_v7 = vadd.f32 1.0, %v3511_v38  ;;  %v1427_v5 = vmul.f32 -0.5, %v3511_v38  ;;  %v1430_v13 = vand.u32 2147483647, %v3511_v38 }
 0x35f   : > { %v1347_v55 = vmul.f32 1.442695, %v1308_v6  ;;  %2422 = vlog2.f32 %v1406_v14  ;;  %v1410_v30 = vadd.f32 1.0, %v1409_v50  ;;  %vm3554_vm1 = vcmp.lt.f32.partialorder %v1412_v52, 0.0004427343  ;;  %v2546_v6 = vld [vmem:[%s2822_s13 + $0x28] sm:$0xff] }
 0x360   : > { %1156 = vmatmul.f32.gmra.mxu3 %v1064_v42  ;;  %v1201_v21 = vpop.f32.mrf.mxu0  ;;  %v3519_v46 = vpop.eup %2420  ;;  %2424 = vlog2.f32 %v1424_v7  ;;  %v1428_v2 = vadd.f32 1.0, %v1427_v5  ;;  %vm3563_vm2 = vcmp.lt.f32.partialorder %v1430_v13, 0.0004427343 }
 0x361   : > { %v3514_v26 = vadd.f32 %v1201_v21, %v3491_v63  ;;  %v1442_v3 = vadd.f32 1.0, %v3519_v46  ;;  %2426 = vpow2.f32 %v1347_v55  ;;  %v1445_v40 = vmul.f32 -0.5, %v3519_v46 }
 0x362   : > { %v1411_v37 = vmul.f32 %v2417_v18, %v1410_v30  ;;  %v1429_v4 = vmul.f32 %v3511_v38, %v1428_v2  ;;  %v1448_v7 = vand.u32 2147483647, %v3519_v46 }
 0x363   : > { %v1278_v42 = vand.u32 2147483647, %v3514_v26  ;;  %2428 = vlog2.f32 %v1442_v3  ;;  %v1446_v36 = vadd.f32 1.0, %v1445_v40  ;;  %v1246_v52 = vmax.f32 %v3514_v26, 0.0 }
 0x364   : > { %vm3586_vm3 = vcmp.lt.f32.partialorder %v1448_v7, 0.0004427343 }
 0x365   : > { %v1310_v45 = vsub.f32 0.0, %v1278_v42  ;;  %v2423_v1 = vpop.eup %2422  ;;  %v1244_v42 = vmax.f32 %v3507_v57, 0.0 }
 0x366   : > { %v1408_v61 = vmul.f32 0.6931472, %v2423_v1 }
 0x367   : > { %v1351_v60 = vmul.f32 1.442695, %v1310_v45 }
 0x368   : > { %1159 = vmatmul.f32.gmra.mxu3 %v1065_v59  ;;  %v1204_v22 = vpop.f32.mrf.mxu0  ;;  %v2425_v59 = vpop.eup %2424 }
 0x369   : > { %v3527_v27 = vadd.f32 %v1204_v22, %v3491_v63  ;;  %v3541_v11 = vpop.eup %2426  ;;  %v1426_v43 = vmul.f32 0.6931472, %v2425_v59  ;;  %v1414_v22 = vsel %vm3554_vm1, %v1411_v37, %v1408_v61  ;;  %v2548_v61 = vld [vmem:[%s2822_s13 + $0x48] sm:$0xff] }
 0x36a   : > { %v2429_v21 = vpop.eup %2428  ;;  %v1460_v24 = vadd.f32 1.0, %v3541_v11  ;;  %v1463_v30 = vmul.f32 -0.5, %v3541_v11  ;;  %v3604_v13 = vmul.f32 %v2548_v61, %v3514_v26 }
 0x36b   : > { %v1280_v0 = vand.u32 2147483647, %v3527_v27  ;;  %v1432_v38 = vsel %vm3563_vm2, %v1429_v4, %v1426_v43  ;;  %v1444_v14 = vmul.f32 0.6931472, %v2429_v21 }
 0x36c   : > { %v3583_v1 = vadd.f32 %v1432_v38, %v1240_v23  ;;  %v1464_v43 = vadd.f32 1.0, %v1463_v30 }
 0x36d   : > { %v1312_v19 = vsub.f32 0.0, %v1280_v0 }
 0x36e   : > { %v1752_v37 = vsub.f32 %v3550_v10, %v3583_v1  ;;  %v1465_v30 = vmul.f32 %v3541_v11, %v1464_v43 }
 0x370   : > { %1162 = vmatmul.f32.gmra.mxu3 %v1066_v53  ;;  %v1207_v17 = vpop.f32.mrf.mxu0 }
 0x371   : > { %v3534_v51 = vadd.f32 %v1207_v17, %v3491_v63 }
 0x373   : > { %v1282_v56 = vand.u32 2147483647, %v3534_v51 }
 0x375   : > { %v1314_v3 = vsub.f32 0.0, %v1282_v56 }
 0x37b   : > { %v1047_v31 = vpop.f32.mrf.mxu3 }
 0x37c   : > { %v1048_v54 = vadd.f32 %v3285_v48, %v1047_v31 }
 0x37e   : > { %v1067_v34 = vmax.f32 %v1048_v54, 0.0 }
 0x380   : > { %1165 = vmatmul.f32.gmra.mxu3 %v1067_v34  ;;  %1230 = vmatmul.f32.gmra.mxu0 %v1067_v34  ;;  %v1210_v31 = vpop.f32.mrf.mxu0 }
 0x383   : > { %v1050_v8 = vpop.f32.mrf.mxu3 }
 0x384   : > { %v1051_v12 = vadd.f32 %v3285_v48, %v1050_v8  ;;  %v1242_v8 = vmax.f32 %v3502_v16, 0.0 }
 0x386   : > { %v1068_v39 = vmax.f32 %v1051_v12, 0.0  ;;  %v3617_v12 = vadd.f32 %v1210_v31, %v3491_v63 }
 0x388   : > { %1168 = vmatmul.f32.gmra.mxu3 %v1068_v39  ;;  %1233 = vmatmul.f32.gmra.mxu0 %v1068_v39  ;;  %v3569_v39 = vmul.f32 %v2546_v6, %v3502_v16  ;;  %v1447_v16 = vmul.f32 %v3519_v46, %v1446_v36  ;;  %v1466_v46 = vand.u32 2147483647, %v3541_v11  ;;  %v1213_v23 = vpop.f32.mrf.mxu0 }
 0x389   : > { %v3620_v6 = vadd.f32 %v1213_v23, %v3491_v63 }
 0x38a   : > { %vm3611_vm4 = vcmp.lt.f32.partialorder %v1466_v46, 0.0004427343 }
 0x38b   : > { %v1124_v48 = vpop.f32.mrf.mxu3 }
 0x38c   : > { %v3523_v47 = vadd.f32 %v1124_v48, %v3516_v44  ;;  %v1355_v48 = vmul.f32 1.442695, %v1312_v19  ;;  %v1248_v19 = vmax.f32 %v3527_v27, 0.0 }
 0x38e   : > { %v1269_v20 = vand.u32 2147483647, %v3523_v47 }
 0x390   : > { %v1301_v9 = vsub.f32 0.0, %v1269_v20  ;;  %v3575_v20 = vadd.f32 %v1414_v22, %v1238_v62  ;;  %v1286_v62 = vand.u32 2147483647, %v3620_v6 }
 0x392   : > { %v1333_v15 = vmul.f32 1.442695, %v1301_v9  ;;  %v1750_v2 = vsub.f32 %v3538_v29, %v3575_v20  ;;  %v1318_v34 = vsub.f32 0.0, %v1286_v62 }
 0x393   : > { %v1127_v53 = vpop.f32.mrf.mxu3 }
 0x394   : > { %2430 = vpow2.f32 %v1333_v15  ;;  %v3544_v25 = vadd.f32 %v1127_v53, %v3516_v44  ;;  %v1450_v15 = vsel %vm3586_vm3, %v1447_v16, %v1444_v14  ;;  %v3596_v53 = vmul.f32 %v2547_v32, %v3507_v57 }
 0x395   : > { %2432 = vpow2.f32 %v1351_v60  ;;  %v1359_v60 = vmul.f32 1.442695, %v1314_v3 }
 0x396   : > { %v1271_v54 = vand.u32 2147483647, %v3544_v25  ;;  %2434 = vlog2.f32 %v1460_v24 }
 0x398   : > { %v1303_v18 = vsub.f32 0.0, %v1271_v54  ;;  %v3609_v54 = vadd.f32 %v1450_v15, %v1242_v8 }
 0x39a   : > { %v2431_v55 = vpop.eup %2430  ;;  %v1337_v50 = vmul.f32 1.442695, %v1303_v18  ;;  %v1754_v11 = vsub.f32 %v3569_v39, %v3609_v54 }
 0x39b   : > { %v1130_v45 = vpop.f32.mrf.mxu3  ;;  %v1397_v17 = vadd.f32 1.0, %v2431_v55  ;;  %v3578_v5 = vpop.eup %2432  ;;  %v1400_v59 = vmul.f32 -0.5, %v2431_v55  ;;  %v1403_v24 = vand.u32 2147483647, %v2431_v55 }
 0x39c   : > { %2436 = vpow2.f32 %v1337_v50  ;;  %v3581_v9 = vadd.f32 %v1130_v45, %v3516_v44  ;;  %v1478_v40 = vadd.f32 1.0, %v3578_v5  ;;  %v2435_v21 = vpop.eup %2434  ;;  %v1481_v18 = vmul.f32 -0.5, %v3578_v5 }
 0x39d   : > { %2438 = vlog2.f32 %v1397_v17  ;;  %v1401_v56 = vadd.f32 1.0, %v1400_v59  ;;  %v1462_v45 = vmul.f32 0.6931472, %v2435_v21  ;;  %v1484_v31 = vand.u32 2147483647, %v3578_v5 }
 0x39e   : > { %2440 = vpow2.f32 %v1355_v48  ;;  %v1273_v0 = vand.u32 2147483647, %v3581_v9  ;;  %v1237_v17 = vmax.f32 %v3523_v47, 0.0  ;;  %vm1404_vm5 = vcmp.lt.f32.partialorder %v1403_v24, 0.0004427343 }
 0x39f   : > { %2442 = vpow2.f32 %v1359_v60  ;;  %v1402_v50 = vmul.f32 %v2431_v55, %v1401_v56  ;;  %v1284_v59 = vand.u32 2147483647, %v3617_v12  ;;  %v1468_v43 = vsel %vm3611_vm4, %v1465_v30, %v1462_v45 }
 0x3a0   : > { %v1305_v41 = vsub.f32 0.0, %v1273_v0  ;;  %2444 = vlog2.f32 %v1478_v40  ;;  %v2549_v0 = vld [vmem:[%s2822_s13] sm:$0xff]  ;;  %v1482_v56 = vadd.f32 1.0, %v1481_v18  ;;  %vm3646_vm6 = vcmp.lt.f32.partialorder %v1484_v31, 0.0004427343 }
 0x3a1   : > { %v1717_v15 = vmul.f32 %v2549_v0, %v3523_v47  ;;  %v1239_v0 = vmax.f32 %v3544_v25, 0.0 }
 0x3a2   : > { %v2437_v4 = vpop.eup %2436  ;;  %v1341_v36 = vmul.f32 1.442695, %v1305_v41  ;;  %v2550_v41 = vld [vmem:[%s2822_s13 + $0x58] sm:$0xff] }
 0x3a3   : > { %v2439_v22 = vpop.eup %2438  ;;  %v1133_v38 = vpop.f32.mrf.mxu3  ;;  %v1415_v8 = vadd.f32 1.0, %v2437_v4  ;;  %v1418_v3 = vmul.f32 -0.5, %v2437_v4  ;;  %v3640_v21 = vmul.f32 %v2550_v41, %v3527_v27 }
 0x3a4   : > { %v3622_v14 = vpop.eup %2440  ;;  %2446 = vpow2.f32 %v1341_v36  ;;  %v3625_v7 = vadd.f32 %v1133_v38, %v3516_v44  ;;  %v1399_v48 = vmul.f32 0.6931472, %v2439_v22  ;;  %v1421_v38 = vand.u32 2147483647, %v2437_v4 }
 0x3a5   : > { %2448 = vlog2.f32 %v1415_v8  ;;  %v1496_v60 = vadd.f32 1.0, %v3622_v14  ;;  %v3634_v55 = vpop.eup %2442  ;;  %v1419_v61 = vadd.f32 1.0, %v1418_v3  ;;  %v1499_v8 = vmul.f32 -0.5, %v3622_v14 }
 0x3a6   : > { %v1275_v16 = vand.u32 2147483647, %v3625_v7  ;;  %v1405_v46 = vsel %vm1404_vm5, %v1402_v50, %v1399_v48  ;;  %v2445_v23 = vpop.eup %2444  ;;  %v1316_v3 = vsub.f32 0.0, %v1284_v59  ;;  %v1502_v45 = vand.u32 2147483647, %v3622_v14 }
 0x3a7   : > { %v1685_v40 = vadd.f32 %v1405_v46, %v1237_v17  ;;  %2450 = vlog2.f32 %v1496_v60  ;;  %v1420_v18 = vmul.f32 %v2437_v4, %v1419_v61  ;;  %vm1422_vm7 = vcmp.lt.f32.partialorder %v1421_v38, 0.0004427343 }
 0x3a8   : > { %v1307_v32 = vsub.f32 0.0, %v1275_v16  ;;  %v1514_v16 = vadd.f32 1.0, %v3634_v55  ;;  %v3660_v60 = vmul.f32 0.6931472, %v2445_v23  ;;  %v1363_v62 = vmul.f32 1.442695, %v1316_v3 }
 0x3a9   : > { %v1749_v22 = vsub.f32 %v1717_v15, %v1685_v40  ;;  %v2551_v40 = vld [vmem:[%s2822_s13 + $0x10] sm:$0xff]  ;;  %v1216_v29 = vpop.f32.mrf.mxu0  ;;  %v3668_v23 = vadd.f32 %v1468_v43, %v1244_v42  ;;  %v1483_v38 = vmul.f32 %v3578_v5, %v1482_v56  ;;  %vm3673_vm8 = vcmp.lt.f32.partialorder %v1502_v45, 0.0004427343 }
 0x3aa   : > { %v2447_v36 = vpop.eup %2446  ;;  %v1345_v24 = vmul.f32 1.442695, %v1307_v32  ;;  %v1367_v32 = vmul.f32 1.442695, %v1318_v34  ;;  %v1719_v61 = vmul.f32 %v2551_v40, %v3544_v25  ;;  %v1250_v40 = vmax.f32 %v3534_v51, 0.0 }
 0x3ab   : > { %v2449_v48 = vpop.eup %2448  ;;  %v1136_v50 = vpop.f32.mrf.mxu3  ;;  %v1433_v17 = vadd.f32 1.0, %v2447_v36  ;;  %v1781_v30 = vadd.f32 %v1750_v2, %v1749_v22  ;;  %v1436_v59 = vmul.f32 -0.5, %v2447_v36  ;;  %v1517_v2 = vmul.f32 -0.5, %v3634_v55 }
 0x3ac   : > { %2452 = vpow2.f32 %v1345_v24  ;;  %v3654_v31 = vadd.f32 %v1136_v50, %v3516_v44  ;;  %v1417_v46 = vmul.f32 0.6931472, %v2449_v48  ;;  %v1439_v50 = vand.u32 2147483647, %v2447_v36 }
 0x3ad   : > { %2454 = vlog2.f32 %v1433_v17  ;;  %1782 = vadd.xlane.f32.xlu2 %v1781_v30  ;;  %v2451_v41 = vpop.eup %2450  ;;  %v1437_v22 = vadd.f32 1.0, %v1436_v59  ;;  %v1500_v17 = vadd.f32 1.0, %v1499_v8  ;;  %v1486_v57 = vsel %vm3646_vm6, %v1483_v38, %v3660_v60 }
 0x3ae   : > { %v1277_v4 = vand.u32 2147483647, %v3654_v31  ;;  %v1423_v15 = vsel %vm1422_vm7, %v1420_v18, %v1417_v46  ;;  %2456 = vlog2.f32 %v1514_v16  ;;  %v1498_v43 = vmul.f32 0.6931472, %v2451_v41 }
 0x3af   : > { %v1687_v20 = vadd.f32 %v1423_v15, %v1239_v0  ;;  %2458 = vpow2.f32 %v1363_v62  ;;  %v1518_v56 = vadd.f32 1.0, %v1517_v2  ;;  %v1438_v46 = vmul.f32 %v2447_v36, %v1437_v22  ;;  %v2552_v15 = vld [vmem:[%s2822_s13 + $0x20] sm:$0xff] }
 0x3b0   : > { %v1309_v24 = vsub.f32 0.0, %v1277_v4  ;;  %2460 = vpow2.f32 %v1367_v32  ;;  %v1241_v59 = vmax.f32 %v3581_v9, 0.0  ;;  %vm1440_vm9 = vcmp.lt.f32.partialorder %v1439_v50, 0.0004427343 }
 0x3b1   : > { %v1751_v3 = vsub.f32 %v1719_v61, %v1687_v20  ;;  %v1501_v62 = vmul.f32 %v3622_v14, %v1500_v17  ;;  %v1520_v4 = vand.u32 2147483647, %v3634_v55  ;;  %v1721_v10 = vmul.f32 %v2552_v15, %v3581_v9  ;;  %v2553_v61 = vld [vmem:[%s2822_s13 + $0x68] sm:$0xff] }
 0x3b2   : > { %v3671_v48 = vpop.eup %2452  ;;  %v1349_v16 = vmul.f32 1.442695, %v1309_v24  ;;  %v3699_v20 = vmul.f32 %v2553_v61, %v3534_v51  ;;  %v1519_v14 = vmul.f32 %v3634_v55, %v1518_v56  ;;  %v3707_v9 = vadd.f32 %v1216_v29, %v3491_v63  ;;  %v1219_v24 = vpop.f32.mrf.mxu0 }
 0x3b3   : > { %v1139_v34 = vpop.f32.mrf.mxu3  ;;  %v1451_v18 = vadd.f32 1.0, %v3671_v48  ;;  %v2455_v42 = vpop.eup %2454  ;;  %v1784_v45 = vadd.f32 %v1752_v37, %v1751_v3  ;;  %v1454_v0 = vmul.f32 -0.5, %v3671_v48  ;;  %v1504_v2 = vsel %vm3673_vm8, %v1501_v62, %v1498_v43 }
 0x3b4   : > { %v3682_v5 = vadd.f32 %v1139_v34, %v3516_v44  ;;  %v2457_v8 = vpop.eup %2456  ;;  %2462 = vpow2.f32 %v1349_v16  ;;  %v1435_v30 = vmul.f32 0.6931472, %v2455_v42  ;;  %v1457_v51 = vand.u32 2147483647, %v3671_v48 }
 0x3b5   : > { %1785 = vadd.xlane.f32.xlu0 %v1784_v45  ;;  %2464 = vlog2.f32 %v1451_v18  ;;  %v1516_v36 = vmul.f32 0.6931472, %v2457_v8  ;;  %v3694_v32 = vpop.eup %2458  ;;  %v1455_v3 = vadd.f32 1.0, %v1454_v0  ;;  %v1756_v25 = vsub.f32 %v3596_v53, %v3668_v23 }
 0x3b6   : > { %v1279_v47 = vand.u32 2147483647, %v3682_v5  ;;  %v1441_v60 = vsel %vm1440_vm9, %v1438_v46, %v1435_v30  ;;  %v3704_v41 = vpop.eup %2460  ;;  %v3716_v55 = vadd.f32 %v1486_v57, %v1246_v52  ;;  %vm3718_vm10 = vcmp.lt.f32.partialorder %v1520_v4, 0.0004427343  ;;  %v2554_v30 = vld [vmem:[%s2822_s13 + $0x30] sm:$0xff] }
 0x3b7   : > { %v1689_v37 = vadd.f32 %v1441_v60, %v1241_v59  ;;  %v3724_v29 = vadd.f32 %v1504_v2, %v1248_v19  ;;  %v1522_v34 = vsel %vm3718_vm10, %v1519_v14, %v1516_v36  ;;  %v1532_v18 = vadd.f32 1.0, %v3694_v32 }
 0x3b8   : > { %v1311_v1 = vsub.f32 0.0, %v1279_v47  ;;  %v1550_v27 = vadd.f32 1.0, %v3704_v41  ;;  %v1243_v19 = vmax.f32 %v3625_v7, 0.0  ;;  %v1288_v23 = vand.u32 2147483647, %v3707_v9 }
 0x3b9   : > { %v1753_v38 = vsub.f32 %v1721_v10, %v1689_v37  ;;  %v1456_v43 = vmul.f32 %v3671_v48, %v1455_v3  ;;  %vm1458_vm11 = vcmp.lt.f32.partialorder %v1457_v51, 0.0004427343  ;;  %v3744_v8 = vadd.f32 %v1522_v34, %v1250_v40  ;;  %v2555_v3 = vld [vmem:[%s2822_s13 + $0x78] sm:$0xff] }
 0x3ba   : > { %v1353_v22 = vmul.f32 1.442695, %v1311_v1  ;;  %v3709_v50 = vpop.eup %2462  ;;  %v1535_v45 = vmul.f32 -0.5, %v3694_v32  ;;  %v1723_v46 = vmul.f32 %v2554_v30, %v3625_v7  ;;  %v1320_v0 = vsub.f32 0.0, %v1288_v23  ;;  %v1222_v36 = vpop.f32.mrf.mxu0 }
 0x3bb   : > { %v1142_v17 = vpop.f32.mrf.mxu3  ;;  %v2465_v42 = vpop.eup %2464  ;;  %v1787_v26 = vadd.f32 %v1754_v11, %v1753_v38  ;;  %v1469_v52 = vadd.f32 1.0, %v3709_v50  ;;  %v1472_v39 = vmul.f32 -0.5, %v3709_v50  ;;  %v1758_v11 = vsub.f32 %v3604_v13, %v3716_v55 }
 0x3bc   : > { %2466 = vpow2.f32 %v1353_v22  ;;  %v3730_v53 = vadd.f32 %v1142_v17, %v3516_v44  ;;  %v1453_v57 = vmul.f32 0.6931472, %v2465_v42  ;;  %v3752_v60 = vadd.f32 %v1219_v24, %v3491_v63 }
 0x3bd   : > { %1788 = vadd.xlane.f32.xlu1 %v1787_v26  ;;  %2468 = vlog2.f32 %v1469_v52  ;;  %v1760_v62 = vsub.f32 %v3640_v21, %v3724_v29  ;;  %v1473_v1 = vadd.f32 1.0, %v1472_v39  ;;  %v1252_v37 = vmax.f32 %v3617_v12, 0.0 }
 0x3be   : > { %v1281_v56 = vand.u32 2147483647, %v3730_v53  ;;  %v1459_v54 = vsel %vm1458_vm11, %v1456_v43, %v1453_v57  ;;  %2470 = vlog2.f32 %v1532_v18  ;;  %v1475_v61 = vand.u32 2147483647, %v3709_v50 }
 0x3bf   : > { %v1691_v48 = vadd.f32 %v1459_v54, %v1243_v19  ;;  %2472 = vlog2.f32 %v1550_v27  ;;  %v1762_v2 = vsub.f32 %v3699_v20, %v3744_v8  ;;  %v1536_v22 = vadd.f32 1.0, %v1535_v45 }
 0x3c0   : > { %v1313_v59 = vsub.f32 0.0, %v1281_v56  ;;  %v1538_v38 = vand.u32 2147483647, %v3694_v32  ;;  %v3767_v17 = vmul.f32 %v2555_v3, %v3617_v12  ;;  %v1290_v51 = vand.u32 2147483647, %v3752_v60 }
 0x3c1   : > { %v1755_v10 = vsub.f32 %v1723_v46, %v1691_v48  ;;  %v1371_v42 = vmul.f32 1.442695, %v1320_v0  ;;  %v1474_v52 = vmul.f32 %v3709_v50, %v1473_v1  ;;  %v1245_v27 = vmax.f32 %v3654_v31, 0.0 }
 0x3c2   : > { %v3749_v47 = vpop.eup %2466  ;;  %v1357_v4 = vmul.f32 1.442695, %v1313_v59  ;;  %vm1476_vm12 = vcmp.lt.f32.partialorder %v1475_v61, 0.0004427343  ;;  %v1553_v23 = vmul.f32 -0.5, %v3704_v41  ;;  %v1254_v57 = vmax.f32 %v3620_v6, 0.0  ;;  %v1225_v3 = vpop.f32.mrf.mxu0 }
 0x3c3   : > { %v1145_v15 = vpop.f32.mrf.mxu3  ;;  %v1487_v7 = vadd.f32 1.0, %v3749_v47  ;;  %v2469_v14 = vpop.eup %2468  ;;  %v1790_v24 = vadd.f32 %v1756_v25, %v1755_v10  ;;  %v1490_v34 = vmul.f32 -0.5, %v3749_v47  ;;  %v3777_v56 = vmul.f32 %v3694_v32, %v1536_v22  ;;  %v2556_v59 = vld [vmem:[%s2822_s13 + $0x40] sm:$0xff] }
 0x3c4   : > { %v3759_v40 = vadd.f32 %v1145_v15, %v3516_v44  ;;  %2474 = vpow2.f32 %v1357_v4  ;;  %v2471_v18 = vpop.eup %2470  ;;  %v1471_v26 = vmul.f32 0.6931472, %v2469_v14  ;;  %vm3779_vm13 = vcmp.lt.f32.partialorder %v1538_v38, 0.0004427343 }
 0x3c5   : > { %1791 = vadd.xlane.f32.xlu2 %v1790_v24  ;;  %2476 = vlog2.f32 %v1487_v7  ;;  %v2473_v25 = vpop.eup %2472  ;;  %v1322_v50 = vsub.f32 0.0, %v1290_v51  ;;  %v1491_v30 = vadd.f32 1.0, %v1490_v34  ;;  %v1725_v48 = vmul.f32 %v2556_v59, %v3654_v31  ;;  %v2558_v59 = vld [vmem:[%s2822_s13 + $0x88] sm:$0xff] }
 0x3c6   : > { %v1283_v16 = vand.u32 2147483647, %v3759_v40  ;;  %v1477_v43 = vsel %vm1476_vm12, %v1474_v52, %v1471_v26  ;;  %2478 = vpow2.f32 %v1371_v42  ;;  %v1493_v4 = vand.u32 2147483647, %v3749_v47 }
 0x3c7   : > { %v1693_v45 = vadd.f32 %v1477_v43, %v1245_v27  ;;  %v1556_v32 = vand.u32 2147483647, %v3704_v41  ;;  %v1534_v15 = vmul.f32 0.6931472, %v2471_v18  ;;  %v1552_v10 = vmul.f32 0.6931472, %v2473_v25 }
 0x3c8   : > { %v1315_v19 = vsub.f32 0.0, %v1283_v16  ;;  %v1554_v1 = vadd.f32 1.0, %v1553_v23  ;;  %v3790_v61 = vadd.f32 %v1222_v36, %v3491_v63  ;;  %v1375_v22 = vmul.f32 1.442695, %v1322_v50 }
 0x3c9   : > { %v1757_v24 = vsub.f32 %v1725_v48, %v1693_v45  ;;  %v1247_v38 = vmax.f32 %v3682_v5, 0.0  ;;  %v1492_v16 = vmul.f32 %v3749_v47, %v1491_v30  ;;  %vm1494_vm14 = vcmp.lt.f32.partialorder %v1493_v4, 0.0004427343  ;;  %v2557_v47 = vld [vmem:[%s2822_s13 + $0x50] sm:$0xff] }
 0x3ca   : > { %v1361_v54 = vmul.f32 1.442695, %v1315_v19  ;;  %v3783_v46 = vpop.eup %2474  ;;  %v1555_v26 = vmul.f32 %v3704_v41, %v1554_v1  ;;  %vm3804_vm15 = vcmp.lt.f32.partialorder %v1556_v32, 0.0004427343  ;;  %v1727_v27 = vmul.f32 %v2557_v47, %v3682_v5  ;;  %v1228_v12 = vpop.f32.mrf.mxu0 }
 0x3cb   : > { %v1148_v0 = vpop.f32.mrf.mxu3  ;;  %v2477_v7 = vpop.eup %2476  ;;  %v1505_v31 = vadd.f32 1.0, %v3783_v46  ;;  %v1793_v36 = vadd.f32 %v1758_v11, %v1757_v24  ;;  %v1508_v18 = vmul.f32 -0.5, %v3783_v46  ;;  %v1292_v13 = vand.u32 2147483647, %v3790_v61 }
 0x3cc   : > { %2480 = vpow2.f32 %v1361_v54  ;;  %v3793_v14 = vadd.f32 %v1148_v0, %v3516_v44  ;;  %v1489_v51 = vmul.f32 0.6931472, %v2477_v7  ;;  %v3808_v25 = vpop.eup %2478  ;;  %v3814_v23 = vadd.f32 %v1225_v3, %v3491_v63 }
 0x3cd   : > { %2482 = vlog2.f32 %v1505_v31  ;;  %1794 = vadd.xlane.f32.xlu2 %v1793_v36  ;;  %v1540_v41 = vsel %vm3779_vm13, %v3777_v56, %v1534_v15  ;;  %v1558_v43 = vsel %vm3804_vm15, %v1555_v26, %v1552_v10  ;;  %v1509_v45 = vadd.f32 1.0, %v1508_v18 }
 0x3ce   : > { %v1285_v34 = vand.u32 2147483647, %v3793_v14  ;;  %v1495_v42 = vsel %vm1494_vm14, %v1492_v16, %v1489_v51  ;;  %2484 = vpow2.f32 %v1375_v22  ;;  %v3823_v48 = vmul.f32 %v2558_v59, %v3620_v6  ;;  %v2559_v16 = vld [vmem:[%s2822_s13 + $0x60] sm:$0xff] }
 0x3cf   : > { %v1695_v11 = vadd.f32 %v1495_v42, %v1247_v38  ;;  %v1511_v4 = vand.u32 2147483647, %v3783_v46  ;;  %v1568_v39 = vadd.f32 1.0, %v3808_v25  ;;  %v1324_v56 = vsub.f32 0.0, %v1292_v13 }
 0x3d0   : > { %v1317_v55 = vsub.f32 0.0, %v1285_v34  ;;  %v3836_v7 = vadd.f32 %v1540_v41, %v1252_v37  ;;  %v3840_v24 = vadd.f32 %v1558_v43, %v1254_v57  ;;  %v1294_v31 = vand.u32 2147483647, %v3814_v23 }
 0x3d1   : > { %v1759_v5 = vsub.f32 %v1727_v27, %v1695_v11  ;;  %v1510_v21 = vmul.f32 %v3783_v46, %v1509_v45  ;;  %v1571_v29 = vmul.f32 -0.5, %v3808_v25  ;;  %v1249_v38 = vmax.f32 %v3730_v53, 0.0 }
 0x3d2   : > { %v2481_v19 = vpop.eup %2480  ;;  %v1365_v50 = vmul.f32 1.442695, %v1317_v55  ;;  %vm1512_vm1 = vcmp.lt.f32.partialorder %v1511_v4, 0.0004427343  ;;  %v1379_v6 = vmul.f32 1.442695, %v1324_v56  ;;  %v1729_v34 = vmul.f32 %v2559_v16, %v3730_v53 }
 0x3d3   : > { %v1151_v54 = vpop.f32.mrf.mxu3  ;;  %v1523_v30 = vadd.f32 1.0, %v2481_v19  ;;  %v1796_v32 = vadd.f32 %v1760_v62, %v1759_v5  ;;  %v1526_v15 = vmul.f32 -0.5, %v2481_v19  ;;  %v2483_v10 = vpop.eup %2482  ;;  %v1574_v51 = vand.u32 2147483647, %v3808_v25 }
 0x3d4   : > { %v3826_v0 = vadd.f32 %v1151_v54, %v3516_v44  ;;  %2486 = vpow2.f32 %v1365_v50  ;;  %v1507_v22 = vmul.f32 0.6931472, %v2483_v10  ;;  %v3845_v62 = vpop.eup %2484  ;;  %v1529_v18 = vand.u32 2147483647, %v2481_v19 }
 0x3d5   : > { %2488 = vlog2.f32 %v1523_v30  ;;  %1797 = vadd.xlane.f32.xlu0 %v1796_v32  ;;  %v1527_v3 = vadd.f32 1.0, %v1526_v15  ;;  %v1326_v26 = vsub.f32 0.0, %v1294_v31  ;;  %v3854_v52 = vadd.f32 %v1228_v12, %v3491_v63  ;;  %v2560_v32 = vld [vmem:[%s2822_s13 + $0x70] sm:$0xff] }
 0x3d6   : > { %v1287_v1 = vand.u32 2147483647, %v3826_v0  ;;  %2490 = vlog2.f32 %v1568_v39  ;;  %v1513_v57 = vsel %vm1512_vm1, %v1510_v21, %v1507_v22  ;;  %v1572_v27 = vadd.f32 1.0, %v1571_v29 }
 0x3d7   : > { %v1697_v46 = vadd.f32 %v1513_v57, %v1249_v38  ;;  %v1586_v13 = vadd.f32 1.0, %v3845_v62  ;;  %v1251_v43 = vmax.f32 %v3759_v40, 0.0  ;;  %v1528_v54 = vmul.f32 %v2481_v19, %v1527_v3 }
 0x3d8   : > { %v1319_v37 = vsub.f32 0.0, %v1287_v1  ;;  %vm1530_vm2 = vcmp.lt.f32.partialorder %v1529_v18, 0.0004427343  ;;  %v1383_v4 = vmul.f32 1.442695, %v1326_v26  ;;  %v1731_v15 = vmul.f32 %v2560_v32, %v3759_v40  ;;  %v2561_v26 = vld [vmem:[%s2822_s13 + $0x98] sm:$0xff] }
 0x3d9   : > { %v1761_v53 = vsub.f32 %v1729_v34, %v1697_v46  ;;  %v1296_v39 = vand.u32 2147483647, %v3854_v52  ;;  %v1764_v1 = vsub.f32 %v3767_v17, %v3836_v7  ;;  %v1766_v20 = vsub.f32 %v3823_v48, %v3840_v24 }
 0x3da   : > { %v1369_v36 = vmul.f32 1.442695, %v1319_v37  ;;  %v3851_v42 = vpop.eup %2486  ;;  %vm3874_vm3 = vcmp.lt.f32.partialorder %v1574_v51, 0.0004427343  ;;  %v1573_v40 = vmul.f32 %v3808_v25, %v1572_v27  ;;  %v1256_v3 = vmax.f32 %v3707_v9, 0.0 }
 0x3db   : > { %v1154_v47 = vpop.f32.mrf.mxu3  ;;  %v2489_v55 = vpop.eup %2488  ;;  %v1541_v41 = vadd.f32 1.0, %v3851_v42  ;;  %v1799_v30 = vadd.f32 %v1762_v2, %v1761_v53  ;;  %v1544_v59 = vmul.f32 -0.5, %v3851_v42  ;;  %v1328_v12 = vsub.f32 0.0, %v1296_v39 }
 0x3dc   : > { %2492 = vpow2.f32 %v1369_v36  ;;  %v3858_v11 = vadd.f32 %v1154_v47, %v3516_v44  ;;  %v1525_v50 = vmul.f32 0.6931472, %v2489_v55  ;;  %v2491_v5 = vpop.eup %2490  ;;  %v1547_v7 = vand.u32 2147483647, %v3851_v42 }
 0x3dd   : > { %2494 = vpow2.f32 %v1379_v6  ;;  %1800 = vadd.xlane.f32.xlu1 %v1799_v30  ;;  %v1570_v8 = vmul.f32 0.6931472, %v2491_v5  ;;  %v1545_v29 = vadd.f32 1.0, %v1544_v59  ;;  %v1589_v51 = vmul.f32 -0.5, %v3845_v62 }
 0x3de   : > { %v1289_v45 = vand.u32 2147483647, %v3858_v11  ;;  %v1531_v56 = vsel %vm1530_vm2, %v1528_v54, %v1525_v50  ;;  %2496 = vlog2.f32 %v1541_v41  ;;  %v3894_v47 = vmul.f32 %v2561_v26, %v3707_v9  ;;  %v2562_v54 = vld [vmem:[%s2822_s13 + $0x80] sm:$0xff]  ;;  %v3923_v26 = vpop.permute.xlu0 %2017 }
 0x3df   : > { %v1699_v19 = vadd.f32 %v1531_v56, %v1251_v43  ;;  %2498 = vlog2.f32 %v1586_v13  ;;  %v1576_v25 = vsel %vm3874_vm3, %v1573_v40, %v1570_v8  ;;  %v1546_v36 = vmul.f32 %v3851_v42, %v1545_v29 }
 0x3e0   : > { %v1321_v10 = vsub.f32 0.0, %v1289_v45  ;;  %2500 = vpow2.f32 %v1383_v4  ;;  %v1387_v27 = vmul.f32 1.442695, %v1328_v12  ;;  %v1253_v13 = vmax.f32 %v3793_v14, 0.0 }
 0x3e1   : > { %v1763_v21 = vsub.f32 %v1731_v15, %v1699_v19  ;;  %vm1548_vm4 = vcmp.lt.f32.partialorder %v1547_v7, 0.0004427343  ;;  %v1704_v43 = vadd.f32 %v1576_v25, %v1256_v3  ;;  %v1733_v42 = vmul.f32 %v2562_v54, %v3793_v14  ;;  %v2563_v7 = vld [vmem:[%s2822_s13 + $0x90] sm:$0xff]  ;;  %v3927_v54 = vpop.permute.xlu2 %2019 }
 0x3e2   : > { %v2493_v31 = vpop.eup %2492  ;;  %v1373_v22 = vmul.f32 1.442695, %v1321_v10  ;;  %v1592_v30 = vand.u32 2147483647, %v3845_v62  ;;  %v1590_v39 = vadd.f32 1.0, %v1589_v51  ;;  %v1255_v2 = vmax.f32 %v3826_v0, 0.0 }
 0x3e3   : > { %v3879_v38 = vpop.eup %2494  ;;  %v1157_v17 = vpop.f32.mrf.mxu3  ;;  %v1559_v48 = vadd.f32 1.0, %v2493_v31  ;;  %v1802_v37 = vadd.f32 %v1764_v1, %v1763_v21  ;;  %v1562_v6 = vmul.f32 -0.5, %v2493_v31  ;;  %v1565_v45 = vand.u32 2147483647, %v2493_v31 }
 0x3e4   : > { %2502 = vpow2.f32 %v1373_v22  ;;  %v3883_v24 = vadd.f32 %v1157_v17, %v3516_v44  ;;  %v2497_v57 = vpop.eup %2496  ;;  %v1604_v46 = vadd.f32 1.0, %v3879_v38  ;;  %v1607_v40 = vmul.f32 -0.5, %v3879_v38 }
 0x3e5   : > { %2504 = vlog2.f32 %v1559_v48  ;;  %1803 = vadd.xlane.f32.xlu2 %v1802_v37  ;;  %v1543_v34 = vmul.f32 0.6931472, %v2497_v57  ;;  %v2499_v18 = vpop.eup %2498  ;;  %v1563_v41 = vadd.f32 1.0, %v1562_v6  ;;  %vm1566_vm5 = vcmp.lt.f32.partialorder %v1565_v45, 0.0004427343  ;;  %v2564_v57 = vld [vmem:[%s2822_s13 + $0xa8] sm:$0xff] }
 0x3e6   : > { %v1291_v16 = vand.u32 2147483647, %v3883_v24  ;;  %v3897_v50 = vpop.eup %2500  ;;  %v1588_v4 = vmul.f32 0.6931472, %v2499_v18  ;;  %2506 = vlog2.f32 %v1604_v46  ;;  %v1258_v17 = vmax.f32 %v3752_v60, 0.0 }
 0x3e7   : > { %v1549_v53 = vsel %vm1548_vm4, %v1546_v36, %v1543_v34  ;;  %2508 = vpow2.f32 %v1387_v27  ;;  %v1564_v8 = vmul.f32 %v2493_v31, %v1563_v41  ;;  %v1622_v12 = vadd.f32 1.0, %v3897_v50 }
 0x3e8   : > { %v1323_v55 = vsub.f32 0.0, %v1291_v16  ;;  %v1701_v5 = vadd.f32 %v1549_v53, %v1253_v13  ;;  %v1735_v48 = vmul.f32 %v2563_v7, %v3826_v0  ;;  %v1768_v25 = vsub.f32 %v3894_v47, %v1704_v43 }
 0x3e9   : > { %v1591_v51 = vmul.f32 %v3845_v62, %v1590_v39  ;;  %vm3918_vm6 = vcmp.lt.f32.partialorder %v1592_v30, 0.0004427343  ;;  %v1610_v0 = vand.u32 2147483647, %v3879_v38  ;;  %v1608_v47 = vadd.f32 1.0, %v1607_v40 }
 0x3ea   : > { %v2503_v59 = vpop.eup %2502  ;;  %v1377_v9 = vmul.f32 1.442695, %v1323_v55  ;;  %v1765_v15 = vsub.f32 %v1733_v42, %v1701_v5  ;;  %v1257_v30 = vmax.f32 %v3858_v11, 0.0  ;;  %v1259_v46 = vmax.f32 %v3883_v24, 0.0 }
 0x3eb   : > { %v2505_v56 = vpop.eup %2504  ;;  %v1160_v32 = vpop.f32.mrf.mxu3  ;;  %v1577_v10 = vadd.f32 1.0, %v2503_v59  ;;  %v1580_v19 = vmul.f32 -0.5, %v2503_v59  ;;  %v1583_v36 = vand.u32 2147483647, %v2503_v59  ;;  %v1609_v39 = vmul.f32 %v3879_v38, %v1608_v47 }
 0x3ec   : > { %2510 = vpow2.f32 %v1377_v9  ;;  %v3903_v1 = vadd.f32 %v1160_v32, %v3516_v44  ;;  %v1561_v14 = vmul.f32 0.6931472, %v2505_v56  ;;  %v1805_v22 = vadd.f32 %v1766_v20, %v1765_v15  ;;  %v2507_v6 = vpop.eup %2506  ;;  %v2565_v32 = vld [vmem:[%s2822_s13 + $0xa0] sm:$0xff] }
 0x3ed   : > { %2512 = vlog2.f32 %v1577_v10  ;;  %v1581_v37 = vadd.f32 1.0, %v1580_v19  ;;  %v1738_v20 = vmul.f32 %v2564_v57, %v3752_v60  ;;  %v3916_v16 = vpop.eup %2508  ;;  %v1594_v60 = vsel %vm3918_vm6, %v1591_v51, %v1588_v4  ;;  %v3954_v51 = vpop.xlane.xlu2 %2060 }
 0x3ee   : > { %v1293_v21 = vand.u32 2147483647, %v3903_v1  ;;  %v1567_v29 = vsel %vm1566_vm5, %v1564_v8, %v1561_v14  ;;  %1806 = vadd.xlane.f32.xlu0 %v1805_v22  ;;  %2514 = vlog2.f32 %v1622_v12  ;;  %v1606_v43 = vmul.f32 0.6931472, %v2507_v6 }
 0x3ef   : > { %v1703_v31 = vadd.f32 %v1567_v29, %v1255_v2  ;;  %v1582_v53 = vmul.f32 %v2503_v59, %v1581_v37  ;;  %vm1584_vm7 = vcmp.lt.f32.partialorder %v1583_v36, 0.0004427343  ;;  %v1706_v9 = vadd.f32 %v1594_v60, %v1258_v17 }
 0x3f0   : > { %v1325_v3 = vsub.f32 0.0, %v1293_v21  ;;  %v1625_v56 = vmul.f32 -0.5, %v3897_v50  ;;  %v1737_v15 = vmul.f32 %v2565_v32, %v3858_v11  ;;  %vm3938_vm8 = vcmp.lt.f32.partialorder %v1610_v0, 0.0004427343  ;;  %v3948_v11 = vpop.permute.xlu1 %2015 }
 0x3f1   : > { %v1767_v34 = vsub.f32 %v1735_v48, %v1703_v31  ;;  %v1640_v14 = vadd.f32 1.0, %v3916_v16  ;;  %v1612_v21 = vsel %vm3938_vm8, %v1609_v39, %v1606_v43  ;;  %v1260_v38 = vmax.f32 %v3790_v61, 0.0 }
 0x3f2   : > { %v2511_v18 = vpop.eup %2510  ;;  %v1381_v27 = vmul.f32 1.442695, %v1325_v3  ;;  %v1770_v40 = vsub.f32 %v1738_v20, %v1706_v9  ;;  %v1626_v48 = vadd.f32 1.0, %v1625_v56  ;;  %v1628_v31 = vand.u32 2147483647, %v3897_v50 }
 0x3f3   : > { %v2513_v62 = vpop.eup %2512  ;;  %v1163_v13 = vpop.f32.mrf.mxu3  ;;  %v1808_v55 = vadd.f32 %v1768_v25, %v1767_v34  ;;  %v1595_v41 = vadd.f32 1.0, %v2511_v18  ;;  %v1598_v45 = vmul.f32 -0.5, %v2511_v18  ;;  %v1601_v12 = vand.u32 2147483647, %v2511_v18 }
 0x3f4   : > { %2516 = vpow2.f32 %v1381_v27  ;;  %v3930_v42 = vadd.f32 %v1163_v13, %v3516_v44  ;;  %v1579_v5 = vmul.f32 0.6931472, %v2513_v62  ;;  %v2515_v8 = vpop.eup %2514  ;;  %v1708_v57 = vadd.f32 %v1612_v21, %v1260_v38  ;;  %v3952_v25 = vpop.permute.xlu0 %1907  ;;  %v2566_v13 = vld [vmem:[%s2822_s13 + $0xb8] sm:$0xff] }
 0x3f5   : > { %1809 = vadd.xlane.f32.xlu1 %v1808_v55  ;;  %2518 = vlog2.f32 %v1595_v41  ;;  %v1599_v22 = vadd.f32 1.0, %v1598_v45  ;;  %v1643_v36 = vmul.f32 -0.5, %v3916_v16  ;;  %vm1602_vm9 = vcmp.lt.f32.partialorder %v1601_v12, 0.0004427343 }
 0x3f6   : > { %v1295_v4 = vand.u32 2147483647, %v3930_v42  ;;  %v1585_v59 = vsel %vm1584_vm7, %v1582_v53, %v1579_v5  ;;  %2520 = vlog2.f32 %v1640_v14  ;;  %v1624_v62 = vmul.f32 0.6931472, %v2515_v8 }
 0x3f7   : > { %v1705_v10 = vadd.f32 %v1585_v59, %v1257_v30  ;;  %v1600_v34 = vmul.f32 %v2511_v18, %v1599_v22  ;;  %v1740_v55 = vmul.f32 %v2566_v13, %v3790_v61  ;;  %v2567_v18 = vld [vmem:[%s2822_s13 + $0xb0] sm:$0xff]  ;;  %v1262_v43 = vmax.f32 %v3814_v23, 0.0 }
 0x3f8   : > { %v1327_v2 = vsub.f32 0.0, %v1295_v4  ;;  %v1739_v53 = vmul.f32 %v2567_v18, %v3883_v24  ;;  %v1627_v45 = vmul.f32 %v3897_v50, %v1626_v48  ;;  %vm3969_vm10 = vcmp.lt.f32.partialorder %v1628_v31, 0.0004427343  ;;  %v3973_v32 = vpop.xlane.xlu1 %2054  ;;  %v2568_v24 = vld [vmem:[%s2822_s13 + $0xc8] sm:$0xff] }
 0x3f9   : > { %v1769_v29 = vsub.f32 %v1737_v15, %v1705_v10  ;;  %v1772_v59 = vsub.f32 %v1740_v55, %v1708_v57  ;;  %v1644_v56 = vadd.f32 1.0, %v1643_v36  ;;  %v1742_v15 = vmul.f32 %v2568_v24, %v3814_v23  ;;  %v3988_v57 = vpop.xlane.xlu2 %2069 }
 0x3fa   : > { %v3946_v17 = vpop.eup %2516  ;;  %v1385_v7 = vmul.f32 1.442695, %v1327_v2  ;;  %v1630_v50 = vsel %vm3969_vm10, %v1627_v45, %v1624_v62  ;;  %v1646_v38 = vand.u32 2147483647, %v3916_v16  ;;  %v1264_v13 = vmax.f32 %v3854_v52, 0.0 }
 0x3fb   : > { %v2519_v37 = vpop.eup %2518  ;;  %v1811_v6 = vadd.f32 %v1770_v40, %v1769_v29  ;;  %v1613_v3 = vadd.f32 1.0, %v3946_v17  ;;  %v1616_v27 = vmul.f32 -0.5, %v3946_v17  ;;  %v1619_v19 = vand.u32 2147483647, %v3946_v17 }
 0x3fc   : > { %2522 = vpow2.f32 %v1385_v7  ;;  %v1597_v20 = vmul.f32 0.6931472, %v2519_v37  ;;  %v2521_v9 = vpop.eup %2520  ;;  %v3981_v29 = vpop.xlane.xlu0 %2057  ;;  %v1710_v37 = vadd.f32 %v1630_v50, %v1262_v43  ;;  %vm3995_vm12 = vcmp.lt.f32.partialorder %v1646_v38, 0.0004427343 }
 0x3fd   : > { %v1231_v0 = vpop.f32.mrf.mxu0  ;;  %1812 = vadd.xlane.f32.xlu2 %v1811_v6  ;;  %2524 = vlog2.f32 %v1613_v3  ;;  %v1617_v39 = vadd.f32 1.0, %v1616_v27  ;;  %v1642_v7 = vmul.f32 0.6931472, %v2521_v9  ;;  %v1645_v6 = vmul.f32 %v3916_v16, %v1644_v56 }
 0x3fe   : > { %v3960_v60 = vadd.f32 %v1231_v0, %v3491_v63  ;;  %v1603_v47 = vsel %vm1602_vm9, %v1600_v34, %v1597_v20  ;;  %v1261_v3 = vmax.f32 %v3903_v1, 0.0  ;;  %vm1620_vm11 = vcmp.lt.f32.partialorder %v1619_v19, 0.0004427343 }
 0x3ff   : > { %v1707_v41 = vadd.f32 %v1603_v47, %v1259_v46  ;;  %v1618_v31 = vmul.f32 %v3946_v17, %v1617_v39  ;;  %v2569_v17 = vld [vmem:[%s2822_s13 + $0xc0] sm:$0xff]  ;;  %v1648_v62 = vsel %vm3995_vm12, %v1645_v6, %v1642_v7  ;;  %v1263_v24 = vmax.f32 %v3930_v42, 0.0 }
 0x400   : > { %v1298_v5 = vand.u32 2147483647, %v3960_v60  ;;  %v1741_v16 = vmul.f32 %v2569_v17, %v3903_v1  ;;  %v1712_v9 = vadd.f32 %v1648_v62, %v1264_v13  ;;  %vm2149_vm2 = vcmask 7168  }
 0x401   : > { %v1771_v4 = vsub.f32 %v1739_v53, %v1707_v41  ;;  %v1774_v41 = vsub.f32 %v1742_v15, %v1710_v37  ;;  %v4020_v38 = vpop.xlane.xlu2 %2078 }
 0x402   : > { %v2523_v61 = vpop.eup %2522  ;;  %v1330_v10 = vsub.f32 0.0, %v1298_v5 }
 0x403   : > { %v2525_v14 = vpop.eup %2524  ;;  %v1166_v8 = vpop.f32.mrf.mxu3  ;;  %v1814_v2 = vadd.f32 %v1772_v59, %v1771_v4  ;;  %v1631_v22 = vadd.f32 1.0, %v2523_v61  ;;  %v1634_v21 = vmul.f32 -0.5, %v2523_v61 }
 0x404   : > { %v1391_v40 = vmul.f32 1.442695, %v1330_v10  ;;  %v3984_v12 = vadd.f32 %v1166_v8, %v3516_v44  ;;  %v1615_v23 = vmul.f32 0.6931472, %v2525_v14  ;;  %v4005_v4 = vpop.xlane.xlu1 %2063  ;;  %v4013_v19 = vpop.xlane.xlu0 %2066  ;;  %v2570_v8 = vld [vmem:[%s2822_s13 + $0xd8] sm:$0xff] }
 0x405   : > { %v1234_v48 = vpop.f32.mrf.mxu0  ;;  %1815 = vadd.xlane.f32.xlu0 %v1814_v2  ;;  %2526 = vlog2.f32 %v1631_v22  ;;  %v1635_v46 = vadd.f32 1.0, %v1634_v21  ;;  %v2571_v2 = vld [vmem:[%s2822_s13 + $0xd0] sm:$0xff] }
 0x406   : > { %2528 = vpow2.f32 %v1391_v40  ;;  %v1297_v20 = vand.u32 2147483647, %v3984_v12  ;;  %v3993_v34 = vadd.f32 %v1234_v48, %v3491_v63  ;;  %v1621_v36 = vsel %vm1620_vm11, %v1618_v31, %v1615_v23 }
 0x407   : > { %v1709_v47 = vadd.f32 %v1621_v36, %v1261_v3  ;;  %v1637_v63 = vand.u32 2147483647, %v2523_v61  ;;  %v1636_v30 = vmul.f32 %v2523_v61, %v1635_v46  ;;  %v1843_v61 = vmul.f32 %v3245_v49, %v3245_v49 }
 0x408   : > { %v1329_v27 = vsub.f32 0.0, %v1297_v20  ;;  %v1300_v55 = vand.u32 2147483647, %v3993_v34  ;;  %v1743_v22 = vmul.f32 %v2571_v2, %v3930_v42 }
 0x409   : > { %v1773_v53 = vsub.f32 %v1741_v16, %v1709_v47  ;;  %vm1638_vm13 = vcmp.lt.f32.partialorder %v1637_v63, 0.0004427343  ;;  %v1939_v49 = vadd.f32 %v3437_v58, %v1843_v61 }
 0x40a   : > { %v1389_v18 = vmul.f32 1.442695, %v1329_v27  ;;  %v1332_v5 = vsub.f32 0.0, %v1300_v55 }
 0x40b   : > { %v2527_v43 = vpop.eup %2526  ;;  %v1169_v45 = vpop.f32.mrf.mxu3  ;;  %v1817_v39 = vadd.f32 %v1774_v41, %v1773_v53  ;;  %v2301_v42 = vadd.f32 -1.0, %v1939_v49 }
 0x40c   : > { %v2529_v1 = vpop.eup %2528  ;;  %2530 = vpow2.f32 %v1389_v18  ;;  %v4008_v59 = vadd.f32 %v1169_v45, %v3516_v44  ;;  %v1633_v56 = vmul.f32 0.6931472, %v2527_v43  ;;  %v1395_v10 = vmul.f32 1.442695, %v1332_v5  ;;  %v4023_v17 = vpop.xlane.xlu1 %2072 }
 0x40d   : > { %v1658_v15 = vadd.f32 1.0, %v2529_v1  ;;  %1818 = vadd.xlane.f32.xlu1 %v1817_v39  ;;  %v1744_v44 = vmul.f32 %v2570_v8, %v3854_v52  ;;  %v1661_v23 = vmul.f32 -0.5, %v2529_v1  ;;  %v1664_v46 = vand.u32 2147483647, %v2529_v1  ;;  %v4026_v47 = vpop.xlane.xlu0 %2075  ;;  %v4028_v53 = vpop.xlane.xlu2 %2087  ;;  %v2573_v8 = vld [vmem:[%s2822_s13 + $0xe0] sm:$0xff] }
 0x40e   : > { %v1299_v50 = vand.u32 2147483647, %v4008_v59  ;;  %v1639_v14 = vsel %vm1638_vm13, %v1636_v30, %v1633_v56  ;;  %2532 = vpow2.f32 %v1395_v10  ;;  %v2051_v58 = vsub.f32 %v2301_v42, %v3923_v26 }
 0x40f   : > { %v1711_v21 = vadd.f32 %v1639_v14, %v1263_v24  ;;  %2534 = vlog2.f32 %v1658_v15  ;;  %v1776_v48 = vsub.f32 %v1744_v44, %v1712_v9  ;;  %v1662_v20 = vadd.f32 1.0, %v1661_v23 }
 0x410   : > { %v1331_v40 = vsub.f32 0.0, %v1299_v50  ;;  %vm1665_vm14 = vcmp.lt.f32.partialorder %v1664_v46, 0.0004427343  ;;  %v1266_v5 = vmax.f32 %v3960_v60, 0.0  ;;  %v1265_v45 = vmax.f32 %v3984_v12, 0.0  ;;  %v2572_v50 = vld [vmem:[%s2822_s13 + $0xe8] sm:$0xff] }
 0x411   : > { %v1775_v7 = vsub.f32 %v1743_v22, %v1711_v21  ;;  %v1663_v13 = vmul.f32 %v2529_v1, %v1662_v20  ;;  %v2095_v26 = vsel %vm939_vm0, %v2051_v58, 0.0  ;;  %v1746_v14 = vmul.f32 %v2572_v50, %v3960_v60 }
 0x412   : > { %v2531_v31 = vpop.eup %2530  ;;  %v1393_v37 = vmul.f32 1.442695, %v1331_v40  ;;  %v1745_v44 = vmul.f32 %v2573_v8, %v3984_v12  ;;  %v1842_v21 = vmul.f32 %v3223_v35, %v3223_v35  ;;  %v2101_v40 = vmul.f32 0.5, %v3973_v32 }
 0x413   : > { %v1820_v6 = vadd.f32 %v1776_v48, %v1775_v7  ;;  %v1649_v3 = vadd.f32 1.0, %v2531_v31  ;;  %v1652_v52 = vmul.f32 -0.5, %v2531_v31  ;;  %v1655_v63 = vand.u32 2147483647, %v2531_v31 }
 0x414   : > { %2536 = vpow2.f32 %v1393_v37  ;;  %v2533_v36 = vpop.eup %2532  ;;  %v4040_v23 = vpop.xlane.xlu1 %2081  ;;  %v1938_v12 = vadd.f32 %v3393_v33, %v1842_v21  ;;  %v1267_v46 = vmax.f32 %v4008_v59, 0.0 }
 0x415   : > { %1821 = vadd.xlane.f32.xlu2 %v1820_v6  ;;  %2538 = vlog2.f32 %v1649_v3  ;;  %v2535_v0 = vpop.eup %2534  ;;  %v1676_v16 = vadd.f32 1.0, %v2533_v36  ;;  %v1653_v62 = vadd.f32 1.0, %v1652_v52  ;;  %v1679_v55 = vmul.f32 -0.5, %v2533_v36  ;;  %v4047_v6 = vpop.xlane.xlu0 %2084 }
 0x416   : > { %v1660_v27 = vmul.f32 0.6931472, %v2535_v0  ;;  %vm1656_vm15 = vcmp.lt.f32.partialorder %v1655_v63, 0.0004427343  ;;  %v1682_v10 = vand.u32 2147483647, %v2533_v36 }
 0x417   : > { %2540 = vlog2.f32 %v1676_v16  ;;  %v1654_v1 = vmul.f32 %v2531_v31, %v1653_v62  ;;  %v1680_v56 = vadd.f32 1.0, %v1679_v55  ;;  %v1268_v52 = vmax.f32 %v3993_v34, 0.0  ;;  %v2575_v63 = vld [vmem:[%s2822_s13 + $0xf0] sm:$0xff] }
 0x418   : > { %v1666_v41 = vsel %vm1665_vm14, %v1663_v13, %v1660_v27  ;;  %vm4042_vm1 = vcmp.lt.f32.partialorder %v1682_v10, 0.0004427343  ;;  %v2300_v58 = vadd.f32 -1.0, %v1938_v12  ;;  %v1844_v27 = vmul.f32 %v3251_v28, %v3251_v28  ;;  %v2574_v13 = vld [vmem:[%s2822_s13 + $0xf8] sm:$0xff] }
 0x419   : > { %v1714_v24 = vadd.f32 %v1666_v41, %v1266_v5  ;;  %v1681_v7 = vmul.f32 %v2533_v36, %v1680_v56  ;;  %v1748_v55 = vmul.f32 %v2574_v13, %v3993_v34  ;;  %v1747_v41 = vmul.f32 %v2575_v63, %v4008_v59 }
 0x41a   : > { %v2537_v18 = vpop.eup %2536  ;;  %v1940_v5 = vadd.f32 %v3952_v25, %v1844_v27  ;;  %v2103_v25 = vmul.f32 0.5, %v3954_v51  ;;  %v2109_v12 = vmul.f32 0.5, %v4020_v38  ;;  %v2112_v38 = vmul.f32 0.5, %v4028_v53 }
 0x41b   : > { %v2539_v43 = vpop.eup %2538  ;;  %v1667_v30 = vadd.f32 1.0, %v2537_v18  ;;  %v1670_v39 = vmul.f32 -0.5, %v2537_v18  ;;  %v1778_v31 = vsub.f32 %v1746_v14, %v1714_v24  ;;  %v1673_v37 = vand.u32 2147483647, %v2537_v18 }
 0x41c   : > { %v1651_v9 = vmul.f32 0.6931472, %v2539_v43  ;;  %v2050_v43 = vsub.f32 %v2300_v58, %v3948_v11  ;;  %v4071_v28 = vpop.xlane.xlu1 %2090 }
 0x41d   : > { %2096 = vadd.xlane.f32.xlu2 %v2095_v26  ;;  %2542 = vlog2.f32 %v1667_v30  ;;  %v2541_v15 = vpop.eup %2540  ;;  %v1671_v49 = vadd.f32 1.0, %v1670_v39  ;;  %vm1674_vm3 = vcmp.lt.f32.partialorder %v1673_v37, 0.0004427343  ;;  %v2302_v39 = vadd.f32 -1.0, %v1940_v5 }
 0x41e   : > { %v1657_v61 = vsel %vm1656_vm15, %v1654_v1, %v1651_v9  ;;  %v1678_v22 = vmul.f32 0.6931472, %v2541_v15  ;;  %v2092_v59 = vsel %vm939_vm0, %v2050_v43, 0.0  ;;  %v2113_v58 = vmul.f32 0.5, %v4071_v28 }
 0x41f   : > { %v1713_v2 = vadd.f32 %v1657_v61, %v1265_v45  ;;  %v1672_v42 = vmul.f32 %v2537_v18, %v1671_v49  ;;  %v2102_v45 = vmul.f32 0.5, %v3981_v29  ;;  %v2052_v11 = vsub.f32 %v2302_v39, %v3927_v54 }
 0x420   : > { %v1783_v3 = vpop.xlane.xlu2 %1782  ;;  %v1684_v35 = vsel %vm4042_vm1, %v1681_v7, %v1678_v22  ;;  %v2104_v61 = vmul.f32 0.5, %v4005_v4  ;;  %v2105_v54 = vmul.f32 0.5, %v4013_v19  ;;  %v2106_v22 = vmul.f32 0.5, %v3988_v57 }
 0x421   : > { %v1777_v48 = vsub.f32 %v1745_v44, %v1713_v2  ;;  %v2117_v20 = vsub.f32 %v1783_v3, %v2101_v40  ;;  %v1716_v16 = vadd.f32 %v1684_v35, %v1268_v52  ;;  %v2098_v10 = vsel %vm939_vm0, %v2052_v11, 0.0 }
 0x422   : > { %v2107_v4 = vmul.f32 0.5, %v4023_v17  ;;  %v2108_v19 = vmul.f32 0.5, %v4026_v47  ;;  %v2110_v17 = vmul.f32 0.5, %v4040_v23 }
 0x423   : > { %v2543_v32 = vpop.eup %2542  ;;  %v1823_v36 = vadd.f32 %v1778_v31, %v1777_v48  ;;  %v2133_v0 = vsub.f32 0.0, %v2117_v20  ;;  %v1780_v30 = vsub.f32 %v1748_v55, %v1716_v16 }
 0x424   : > { %v1669_v33 = vmul.f32 0.6931472, %v2543_v32 }
 0x425   : > { %1824 = vadd.xlane.f32.xlu0 %v1823_v36  ;;  %2150 = vst.msk [vmem:[%s4057_s22] sm:$0xff] %vm2149_vm2, %v2133_v0  ;;  %v2111_v36 = vmul.f32 0.5, %v4047_v6 }
 0x426   : > { %v1675_v62 = vsel %vm1674_vm3, %v1672_v42, %v1669_v33 }
 0x427   : > { %v1715_v18 = vadd.f32 %v1675_v62, %v1267_v46 }
 0x428   : > { %v1786_v9 = vpop.xlane.xlu0 %1785 }
 0x429   : > { %v1779_v26 = vsub.f32 %v1747_v41, %v1715_v18  ;;  %v2118_v34 = vsub.f32 %v1786_v9, %v2102_v45 }
 0x42b   : > { %v1826_v1 = vadd.f32 %v1780_v30, %v1779_v26  ;;  %v2134_v56 = vsub.f32 0.0, %v2118_v34 }
 0x42d   : > { %2093 = vadd.xlane.f32.xlu0 %v2092_v59  ;;  %1827 = vadd.xlane.f32.xlu1 %v1826_v1  ;;  %2151 = vst.msk [vmem:[%s4057_s22 + $0x8] sm:$0xff] %vm2149_vm2, %v2134_v56 }
 0x430   : > { %v1789_v29 = vpop.xlane.xlu1 %1788 }
 0x431   : > { %v2119_v24 = vsub.f32 %v1789_v29, %v2103_v25 }
 0x433   : > { %v2135_v15 = vsub.f32 0.0, %v2119_v24 }
 0x435   : > { %2099 = vadd.xlane.f32.xlu1 %v2098_v10  ;;  %2152 = vst.msk [vmem:[%s4057_s22 + $0x10] sm:$0xff] %vm2149_vm2, %v2135_v15 }
 0x438   : > { %v1792_v50 = vpop.xlane.xlu2 %1791 }
 0x439   : > { %v2120_v14 = vsub.f32 %v1792_v50, %v2104_v61 }
 0x43b   : > { %v2136_v8 = vsub.f32 0.0, %v2120_v14 }
 0x43d   : > { %2153 = vst.msk [vmem:[%s4057_s22 + $0x18] sm:$0xff] %vm2149_vm2, %v2136_v8 }
 0x440   : > { %v1795_v51 = vpop.xlane.xlu2 %1794 }
 0x441   : > { %v2121_v44 = vsub.f32 %v1795_v51, %v2105_v54 }
 0x443   : > { %v2137_v2 = vsub.f32 0.0, %v2121_v44 }
 0x445   : > { %2154 = vst.msk [vmem:[%s4057_s22 + $0x20] sm:$0xff] %vm2149_vm2, %v2137_v2 }
 0x448   : > { %v1798_v21 = vpop.xlane.xlu0 %1797 }
 0x449   : > { %v2122_v40 = vsub.f32 %v1798_v21, %v2106_v22 }
 0x44b   : > { %v2138_v49 = vsub.f32 0.0, %v2122_v40 }
 0x44d   : > { %2155 = vst.msk [vmem:[%s4057_s22 + $0x28] sm:$0xff] %vm2149_vm2, %v2138_v49 }
 0x450   : > { %v1801_v7 = vpop.xlane.xlu1 %1800 }
 0x451   : > { %v2123_v48 = vsub.f32 %v1801_v7, %v2107_v4 }
 0x453   : > { %v2139_v31 = vsub.f32 0.0, %v2123_v48 }
 0x455   : > { %2156 = vst.msk [vmem:[%s4057_s22 + $0x30] sm:$0xff] %vm2149_vm2, %v2139_v31 }
 0x458   : > { %v1804_v37 = vpop.xlane.xlu2 %1803 }
 0x459   : > { %v2124_v57 = vsub.f32 %v1804_v37, %v2108_v19 }
 0x45b   : > { %v2140_v60 = vsub.f32 0.0, %v2124_v57 }
 0x45d   : > { %2157 = vst.msk [vmem:[%s4057_s22 + $0x38] sm:$0xff] %vm2149_vm2, %v2140_v60 }
 0x461   : > { %v1807_v3 = vpop.xlane.xlu0 %1806 }
 0x462   : > { %v2125_v35 = vsub.f32 %v1807_v3, %v2109_v12 }
 0x464   : > { %v2141_v32 = vsub.f32 0.0, %v2125_v35 }
 0x466   : > { %2158 = vst.msk [vmem:[%s4057_s22 + $0x40] sm:$0xff] %vm2149_vm2, %v2141_v32 }
 0x468   : > { %v1810_v52 = vpop.xlane.xlu1 %1809 }
 0x469   : > { %v2126_v47 = vsub.f32 %v1810_v52, %v2110_v17 }
 0x46b   : > { %v2142_v20 = vsub.f32 0.0, %v2126_v47 }
 0x46d   : > { %2159 = vst.msk [vmem:[%s4057_s22 + $0x48] sm:$0xff] %vm2149_vm2, %v2142_v20 }
 0x470   : > { %v1813_v33 = vpop.xlane.xlu2 %1812 }
 0x471   : > { %v2127_v42 = vsub.f32 %v1813_v33, %v2111_v36 }
 0x473   : > { %v2143_v46 = vsub.f32 0.0, %v2127_v42 }
 0x475   : > { %2160 = vst.msk [vmem:[%s4057_s22 + $0x50] sm:$0xff] %vm2149_vm2, %v2143_v46 }
 0x478   : > { %v1816_v0 = vpop.xlane.xlu0 %1815 }
 0x479   : > { %v2128_v23 = vsub.f32 %v1816_v0, %v2112_v38 }
 0x47b   : > { %v2144_v16 = vsub.f32 0.0, %v2128_v23 }
 0x47d   : > { %2161 = vst.msk [vmem:[%s4057_s22 + $0x58] sm:$0xff] %vm2149_vm2, %v2144_v16 }
 0x480   : > { %v1819_v27 = vpop.xlane.xlu1 %1818 }
 0x481   : > { %v2129_v62 = vsub.f32 %v1819_v27, %v2113_v58 }
 0x483   : > { %v2145_v13 = vsub.f32 0.0, %v2129_v62 }
 0x485   : > { %2162 = vst.msk [vmem:[%s4057_s22 + $0x60] sm:$0xff] %vm2149_vm2, %v2145_v13 }
 0x488   : > { %v1822_v6 = vpop.xlane.xlu2 %1821 }
 0x490   : > { %v2097_v55 = vpop.xlane.xlu2 %2096 }
 0x491   : > { %v2115_v63 = vmul.f32 0.5, %v2097_v55 }
 0x498   : > { %v1825_v41 = vpop.xlane.xlu0 %1824 }
 0x499   : > { %v2131_v53 = vsub.f32 %v1825_v41, %v2115_v63 }
 0x49b   : > { %v2147_v18 = vsub.f32 0.0, %v2131_v53 }
 0x49d   : > { %2164 = vst.msk [vmem:[%s4057_s22 + $0x70] sm:$0xff] %vm2149_vm2, %v2147_v18 }
 0x4a0   : > { %v1828_v43 = vpop.xlane.xlu1 %1827  ;;  %v2094_v5 = vpop.xlane.xlu0 %2093 }
 0x4a1   : > { %v2114_v45 = vmul.f32 0.5, %v2094_v5 }
 0x4a3   : > { %v2130_v26 = vsub.f32 %v1822_v6, %v2114_v45 }
 0x4a5   : > { %v2146_v30 = vsub.f32 0.0, %v2130_v26 }
 0x4a7   : > { %2163 = vst.msk [vmem:[%s4057_s22 + $0x68] sm:$0xff] %vm2149_vm2, %v2146_v30 }
 0x4a8   : > { %v2100_v28 = vpop.xlane.xlu1 %2099 }
 0x4a9   : > { %v2116_v9 = vmul.f32 0.5, %v2100_v28 }
 0x4ab   : > { %v2132_v34 = vsub.f32 %v1828_v43, %v2116_v9 }
 0x4ad   : > { %v2148_v1 = vsub.f32 0.0, %v2132_v34 }
 0x4af   : > { %2165 = vst.msk [vmem:[%s4057_s22 + $0x78] sm:$0xff] %vm2149_vm2, %v2148_v1 }
 0x4b0 PF: > { %p21_p4 = scmp.ge.s32.totalorder %s2782_s26, 4   ;;  %s4183_s13 = smov %s2666_s14 }
 0x4b1   : > { %s4184_s14 = smov %s2670_s15  ;;  %s4185_s15 = smov %s2795_s11 }
 0x4b2   : > { %s4186_s16 = smov %s2782_s26  ;;  %23 = sbr.rel (!%p21_p4) target bundleno = 8 (0x8), region = 107 }
 0x4b7   :  { %2188 = vsyncpa [#allocation3], 1 }
 0x4b8   :  { %2190 = vsyncpa [#allocation3 + $0x1], 1 }
 0x4b9   :  { %2191 = vsyncpa [#allocation5], 1 }

</bundles_post_ra>
